<compile_context>
chip_gen: v5e
topology: v5e:2x2
jax: 0.10.0
libtpu: 0.0.40
codegen_flags: <defaults>
</compile_context>

<pallas_src>
import functools

import jax
import jax.numpy as jnp
from jax.experimental import pallas as pl
from jax.experimental.pallas import tpu as pltpu

HIDDEN = 64  # hardcoded in InferenceNet.__init__


def _softplus(x):
    # numerically stable, matches F.softplus
    return jnp.maximum(x, 0.0) + jnp.log(1.0 + jnp.exp(-jnp.abs(x)))


def _softmax(s):
    m = jnp.max(s, axis=-1, keepdims=True)
    e = jnp.exp(s - m)
    denom = jnp.sum(e, axis=-1, keepdims=True)
    # approx=True lowers to the EUP vrcp slot (otherwise idle) -> frees VALU cycles.
    return e * pl.reciprocal(denom, approx=True)


def _mm(a_f32, w_bf16_ref):
    # bf16 x bf16 MXU matmul with f32 accumulation.
    return jnp.dot(a_f32.astype(jnp.bfloat16), w_bf16_ref[...],
                   preferred_element_type=jnp.float32)


def inference_net_kernel(x_ref, gumbel_ref, eps_ref,
                         w1x2_ref, b1_ref, wl_ref, bl_ref,
                         w2y_ref, b2_ref, wmv_ref, bmv_ref,
                         out_ref, *, inv_temperature):
    z_dim = eps_ref.shape[-1]
    y_dim = gumbel_ref.shape[-1]

    # ---- fused x-projection: [w1 | w2x] -> (TB, 2*HIDDEN) = 128 MXU output lanes ----
    xproj = _mm(x_ref[...], w1x2_ref)   # one x->bf16 cast, one MXU push

    # ---- qyx: Linear -> ReLU -> GumbelSoftmax (soft path, hard=0) ----
    h1 = jnp.maximum(xproj[:, :HIDDEN] + b1_ref[...], 0.0)
    logits = _mm(h1, wl_ref) + bl_ref[...]
    prob = _softmax(logits)
    y = _softmax((logits + gumbel_ref[...]) * inv_temperature)
    # TODO(synk): hard=1 straight-through (argmax one-hot) path not implemented.

    # ---- qzxy: Linear(cat(x, y)) -> ReLU -> Gaussian (split-weight concat) ----
    h2 = jnp.maximum(xproj[:, HIDDEN:] + _mm(y, w2y_ref) + b2_ref[...], 0.0)
    muvar = _mm(h2, wmv_ref) + bmv_ref[...]          # fused mu|var heads
    mu = muvar[:, :z_dim]
    var = _softplus(muvar[:, z_dim:])
    z = mu + eps_ref[...] * jnp.sqrt(var + 1e-10)

    # ---- single lane-dense output slab: mu | var | z | logits | prob | y ----
    out_ref[:, 0:z_dim] = mu
    out_ref[:, z_dim:2 * z_dim] = var
    out_ref[:, 2 * z_dim:3 * z_dim] = z
    o = 3 * z_dim
    out_ref[:, o:o + y_dim] = logits
    out_ref[:, o + y_dim:o + 2 * y_dim] = prob
    out_ref[:, o + 2 * y_dim:o + 3 * y_dim] = y


def inference_net(x, gumbel, eps, params, *, temperature=1.0, batch_tile=2048):
    """Pallas wrapper reproducing InferenceNet.forward (soft gumbel, hard=0)."""
    B, x_dim = x.shape
    y_dim = gumbel.shape[1]
    z_dim = eps.shape[1]
    out_w = 3 * z_dim + 3 * y_dim   # packed output slab width

    def round_up(a, m):
        return ((a + m - 1) // m) * m

    # Big tile (per-step overhead + HBM roofline), but keep the grid >= 2 steps so the
    # "parallel" axis can shard across both v7x TensorCores. Multiple of 8 sublanes.
    # TB=2048 fits v5e's 16 MiB scoped-VMEM default; raise vmem_limit_bytes for more.
    TB = round_up(min(batch_tile, round_up(pl.cdiv(B, 2), 8)), 8)
    padded_B = round_up(B, TB)
    if padded_B != B:
        pad = lambda a: jnp.pad(a, ((0, padded_B - a.shape[0]), (0, 0)))
        x, gumbel, eps = pad(x), pad(gumbel), pad(eps)

    grid = (padded_B // TB,)
    row = lambda i: (i, 0)   # batch-tiled arrays
    cst = lambda i: (0, 0)   # VMEM-resident weights / biases

    in_specs = [
        pl.BlockSpec((TB, x_dim), row),
        pl.BlockSpec((TB, y_dim), row),
        pl.BlockSpec((TB, z_dim), row),
        pl.BlockSpec((x_dim, 2 * HIDDEN), cst),
        pl.BlockSpec((1, HIDDEN), cst),
        pl.BlockSpec((HIDDEN, y_dim), cst),
        pl.BlockSpec((1, y_dim), cst),
        pl.BlockSpec((y_dim, HIDDEN), cst),
        pl.BlockSpec((1, HIDDEN), cst),
        pl.BlockSpec((HIDDEN, 2 * z_dim), cst),
        pl.BlockSpec((1, 2 * z_dim), cst),
    ]
    out_specs = pl.BlockSpec((TB, out_w), row)
    out_shape = jax.ShapeDtypeStruct((padded_B, out_w), jnp.float32)

    matmul_params = (x_dim * 2 * HIDDEN + HIDDEN * y_dim
                     + y_dim * HIDDEN + HIDDEN * 2 * z_dim)
    cost = pl.CostEstimate(
        flops=2 * padded_B * matmul_params,
        transcendentals=padded_B * (2 * y_dim + 3 * z_dim + 4),
        bytes_accessed=(2 * matmul_params                            # bf16 weights
                        + 4 * (2 * HIDDEN + y_dim + 2 * z_dim)       # f32 biases
                        + 4 * padded_B * (x_dim + y_dim + z_dim + out_w)),  # f32 acts
    )

    kernel = functools.partial(inference_net_kernel,
                               inv_temperature=float(1.0 / temperature))

    slab = pl.pallas_call(
        kernel,
        grid=grid,
        in_specs=in_specs,
        out_specs=out_specs,
        out_shape=out_shape,
        compiler_params=pltpu.CompilerParams(dimension_semantics=("parallel",)),
        cost_estimate=cost,
    )(x, gumbel, eps,
      params["w1x2"], params["b1"], params["wl"], params["bl"],
      params["w2y"], params["b2"], params["wmv"], params["bmv"])

    slab = slab[:B]
    o = 3 * z_dim
    return {
        "mean":        slab[:, 0:z_dim],
        "var":         slab[:, z_dim:2 * z_dim],
        "gaussian":    slab[:, 2 * z_dim:3 * z_dim],
        "logits":      slab[:, o:o + y_dim],
        "prob_cat":    slab[:, o + y_dim:o + 2 * y_dim],
        "categorical": slab[:, o + 2 * y_dim:o + 3 * y_dim],
    }


def init_params(key, x_dim, z_dim, y_dim):
    """Deterministic synthetic parameters (PyTorch-Linear-like uniform init).

    Matmul weights are stored bf16 (halves weight HBM traffic); biases stay f32.
    """
    def linear(key, fan_in, fan_out):
        kw, kb = jax.random.split(key)
        bound = 1.0 / jnp.sqrt(fan_in)
        w = jax.random.uniform(kw, (fan_in, fan_out), jnp.float32, -bound, bound)
        b = jax.random.uniform(kb, (1, fan_out), jnp.float32, -bound, bound)
        return w, b

    k1, k2, k3, k4, k5 = jax.random.split(key, 5)
    w1, b1 = linear(k1, x_dim, HIDDEN)            # inference_qyx[0]
    wl, bl = linear(k2, HIDDEN, y_dim)            # GumbelSoftmax.logits
    w2, b2 = linear(k3, x_dim + y_dim, HIDDEN)    # inference_qzyx[0]
    w_mu, b_mu = linear(k4, HIDDEN, z_dim)        # Gaussian.mu
    w_var, b_var = linear(k5, HIDDEN, z_dim)      # Gaussian.var

    bf16 = lambda w: w.astype(jnp.bfloat16)
    return {
        # fuse [w1 | w2x] so both x-projections are one 128-wide MXU matmul
        "w1x2": bf16(jnp.concatenate([w1, w2[:x_dim]], axis=1)),
        "b1": b1,
        "wl": bf16(wl), "bl": bl,
        "w2y": bf16(w2[x_dim:]), "b2": b2,
        # fuse mu|var heads into one weight
        "wmv": bf16(jnp.concatenate([w_mu, w_var], axis=1)),
        "bmv": jnp.concatenate([b_mu, b_var], axis=1),
    }


def _reference(x, gumbel, eps, params, *, temperature=1.0):
    """Plain-JAX reference mirroring the kernel's bf16-weight math."""
    z_dim = eps.shape[1]
    mm = lambda a, w: jnp.dot(a.astype(jnp.bfloat16), w,
                              preferred_element_type=jnp.float32)

    def softmax(s):
        m = jnp.max(s, axis=-1, keepdims=True)
        e = jnp.exp(s - m)
        return e / jnp.sum(e, axis=-1, keepdims=True)

    softplus = lambda v: jnp.maximum(v, 0.0) + jnp.log(1.0 + jnp.exp(-jnp.abs(v)))

    xproj = mm(x, params["w1x2"])
    h1 = jnp.maximum(xproj[:, :HIDDEN] + params["b1"], 0.0)
    logits = mm(h1, params["wl"]) + params["bl"]
    prob = softmax(logits)
    y = softmax((logits + gumbel) / temperature)
    h2 = jnp.maximum(xproj[:, HIDDEN:] + mm(y, params["w2y"]) + params["b2"], 0.0)
    muvar = mm(h2, params["wmv"]) + params["bmv"]
    mu = muvar[:, :z_dim]
    var = softplus(muvar[:, z_dim:])
    z = mu + eps * jnp.sqrt(var + 1e-10)
    return {"mean": mu, "var": var, "gaussian": z,
            "logits": logits, "prob_cat": prob, "categorical": y}


if __name__ == "__main__":
    # Small shapes consistent with the module; B=260 exercises padding + a 2-step grid.
    B, x_dim, z_dim, y_dim = 260, 64, 32, 16
    temperature = 1.0

    key = jax.random.PRNGKey(0)
    kp, kx, kg, ke = jax.random.split(key, 4)

    params = init_params(kp, x_dim, z_dim, y_dim)
    x = jax.random.normal(kx, (B, x_dim), jnp.float32)

    # Noise sampled outside the kernel (functional-JAX style), matching the PyTorch
    # module's internal torch.rand / torch.randn draws semantically.
    u = jax.random.uniform(kg, (B, y_dim), jnp.float32)
    gumbel = -jnp.log(-jnp.log(u + 1e-20) + 1e-20)
    eps = jax.random.normal(ke, (B, z_dim), jnp.float32)

    out = inference_net(x, gumbel, eps, params, temperature=temperature)
    jax.block_until_ready(out)

    ref = _reference(x, gumbel, eps, params, temperature=temperature)
    # Tolerance accounts for MXU accumulation order, bf16 re-rounding of chained
    # activations, and the approximate (EUP vrcp) softmax reciprocal.
    for k in ("mean", "var", "gaussian", "logits", "prob_cat", "categorical"):
        assert out[k].shape == ref[k].shape, (k, out[k].shape, ref[k].shape)
        err = float(jnp.max(jnp.abs(out[k] - ref[k])))
        assert jnp.allclose(out[k], ref[k], atol=5e-3, rtol=5e-3), (k, err)

    print("KERNEL_OK")
</pallas_src>

<mosaic_0001>
module attributes {stable_mosaic.version = 11 : i64} {
  func.func @inference_net_kernel(%arg0: i32, %arg1: memref<136x64xf32, #tpu.memory_space<vmem>>, %arg2: memref<136x16xf32, #tpu.memory_space<vmem>>, %arg3: memref<136x32xf32, #tpu.memory_space<vmem>>, %arg4: memref<64x128xbf16, #tpu.memory_space<vmem>>, %arg5: memref<1x64xf32, #tpu.memory_space<vmem>>, %arg6: memref<64x16xbf16, #tpu.memory_space<vmem>>, %arg7: memref<1x16xf32, #tpu.memory_space<vmem>>, %arg8: memref<16x64xbf16, #tpu.memory_space<vmem>>, %arg9: memref<1x64xf32, #tpu.memory_space<vmem>>, %arg10: memref<64x64xbf16, #tpu.memory_space<vmem>>, %arg11: memref<1x64xf32, #tpu.memory_space<vmem>>, %arg12: memref<136x144xf32, #tpu.memory_space<vmem>>) attributes {dimension_semantics = [#tpu.dimension_semantics<parallel>], iteration_bounds = array<i64: 2>, scalar_prefetch = 0 : i64, scratch_operands = 0 : i64, tpu.core_type = #tpu.core_type<tc>, window_params = [{transform_indices = @transform_0, window_bounds = array<i64: 136, 64>}, {transform_indices = @transform_1, window_bounds = array<i64: 136, 16>}, {transform_indices = @transform_2, window_bounds = array<i64: 136, 32>}, {pipeline_mode = #tpu.pipeline_mode<synchronous>, transform_indices = @transform_3, window_bounds = array<i64: 64, 128>}, {pipeline_mode = #tpu.pipeline_mode<synchronous>, transform_indices = @transform_4, window_bounds = array<i64: 1, 64>}, {pipeline_mode = #tpu.pipeline_mode<synchronous>, transform_indices = @transform_5, window_bounds = array<i64: 64, 16>}, {pipeline_mode = #tpu.pipeline_mode<synchronous>, transform_indices = @transform_6, window_bounds = array<i64: 1, 16>}, {pipeline_mode = #tpu.pipeline_mode<synchronous>, transform_indices = @transform_7, window_bounds = array<i64: 16, 64>}, {pipeline_mode = #tpu.pipeline_mode<synchronous>, transform_indices = @transform_8, window_bounds = array<i64: 1, 64>}, {pipeline_mode = #tpu.pipeline_mode<synchronous>, transform_indices = @transform_9, window_bounds = array<i64: 64, 64>}, {pipeline_mode = #tpu.pipeline_mode<synchronous>, transform_indices = @transform_10, window_bounds = array<i64: 1, 64>}, {transform_indices = @transform_11, window_bounds = array<i64: 136, 144>}]} {
    %c0 = arith.constant 0 : index
    %c0_0 = arith.constant 0 : index
    %0 = vector.load %arg1[%c0, %c0_0] : memref<136x64xf32, #tpu.memory_space<vmem>>, vector<136x64xf32>
    %1 = arith.truncf %0 : vector<136x64xf32> to vector<136x64xbf16>
    %c0_1 = arith.constant 0 : index
    %c0_2 = arith.constant 0 : index
    %2 = vector.load %arg4[%c0_1, %c0_2] : memref<64x128xbf16, #tpu.memory_space<vmem>>, vector<64x128xbf16>
    %cst = arith.constant dense<0.000000e+00> : vector<136x128xf32>
    %3 = tpu.matmul %1, %2, %cst {dimension_numbers = #tpu.dot_dimension_numbers<[1], [0], [0], [1], [0, 0, 1, 1], [], []>} : vector<136x64xbf16>, vector<64x128xbf16>, vector<136x128xf32> -> vector<136x128xf32>
    %4 = vector.extract_strided_slice %3 {offsets = [0, 0], sizes = [136, 64], strides = [1, 1]} : vector<136x128xf32> to vector<136x64xf32>
    %c0_3 = arith.constant 0 : index
    %c0_4 = arith.constant 0 : index
    %5 = vector.load %arg5[%c0_3, %c0_4] : memref<1x64xf32, #tpu.memory_space<vmem>>, vector<1x64xf32>
    %6 = vector.broadcast %5 : vector<1x64xf32> to vector<136x64xf32>
    %7 = arith.addf %4, %6 : vector<136x64xf32>
    %cst_5 = arith.constant 0.000000e+00 : f32
    %8 = vector.broadcast %cst_5 : f32 to vector<136x64xf32>
    %9 = arith.maximumf %7, %8 : vector<136x64xf32>
    %10 = arith.truncf %9 : vector<136x64xf32> to vector<136x64xbf16>
    %c0_6 = arith.constant 0 : index
    %c0_7 = arith.constant 0 : index
    %11 = vector.load %arg6[%c0_6, %c0_7] : memref<64x16xbf16, #tpu.memory_space<vmem>>, vector<64x16xbf16>
    %cst_8 = arith.constant dense<0.000000e+00> : vector<136x16xf32>
    %12 = tpu.matmul %10, %11, %cst_8 {dimension_numbers = #tpu.dot_dimension_numbers<[1], [0], [0], [1], [0, 0, 1, 1], [], []>} : vector<136x64xbf16>, vector<64x16xbf16>, vector<136x16xf32> -> vector<136x16xf32>
    %c0_9 = arith.constant 0 : index
    %c0_10 = arith.constant 0 : index
    %13 = vector.load %arg7[%c0_9, %c0_10] : memref<1x16xf32, #tpu.memory_space<vmem>>, vector<1x16xf32>
    %14 = vector.broadcast %13 : vector<1x16xf32> to vector<136x16xf32>
    %15 = arith.addf %12, %14 : vector<136x16xf32>
    %cst_11 = arith.constant dense<0xFF800000> : vector<136xf32>
    %16 = vector.multi_reduction <maximumf>, %15, %cst_11 [1] : vector<136x16xf32> to vector<136xf32>
    %17 = vector.shape_cast %16 : vector<136xf32> to vector<136x1xf32>
    %18 = vector.broadcast %17 : vector<136x1xf32> to vector<136x16xf32>
    %19 = arith.subf %15, %18 : vector<136x16xf32>
    %20 = math.exp %19 : vector<136x16xf32>
    %cst_12 = arith.constant dense<0.000000e+00> : vector<136xf32>
    %21 = vector.multi_reduction <add>, %20, %cst_12 [1] : vector<136x16xf32> to vector<136xf32>
    %22 = vector.shape_cast %21 : vector<136xf32> to vector<136x1xf32>
    %23 = tpu.reciprocal %22 {approx = true} : vector<136x1xf32> -> vector<136x1xf32>
    %24 = vector.broadcast %23 : vector<136x1xf32> to vector<136x16xf32>
    %25 = arith.mulf %20, %24 : vector<136x16xf32>
    %c0_13 = arith.constant 0 : index
    %c0_14 = arith.constant 0 : index
    %26 = vector.load %arg2[%c0_13, %c0_14] : memref<136x16xf32, #tpu.memory_space<vmem>>, vector<136x16xf32>
    %27 = arith.addf %15, %26 : vector<136x16xf32>
    %cst_15 = arith.constant 1.000000e+00 : f32
    %28 = vector.broadcast %cst_15 : f32 to vector<136x16xf32>
    %29 = arith.mulf %27, %28 : vector<136x16xf32>
    %cst_16 = arith.constant dense<0xFF800000> : vector<136xf32>
    %30 = vector.multi_reduction <maximumf>, %29, %cst_16 [1] : vector<136x16xf32> to vector<136xf32>
    %31 = vector.shape_cast %30 : vector<136xf32> to vector<136x1xf32>
    %32 = vector.broadcast %31 : vector<136x1xf32> to vector<136x16xf32>
    %33 = arith.subf %29, %32 : vector<136x16xf32>
    %34 = math.exp %33 : vector<136x16xf32>
    %cst_17 = arith.constant dense<0.000000e+00> : vector<136xf32>
    %35 = vector.multi_reduction <add>, %34, %cst_17 [1] : vector<136x16xf32> to vector<136xf32>
    %36 = vector.shape_cast %35 : vector<136xf32> to vector<136x1xf32>
    %37 = tpu.reciprocal %36 {approx = true} : vector<136x1xf32> -> vector<136x1xf32>
    %38 = vector.broadcast %37 : vector<136x1xf32> to vector<136x16xf32>
    %39 = arith.mulf %34, %38 : vector<136x16xf32>
    %40 = vector.extract_strided_slice %3 {offsets = [0, 64], sizes = [136, 64], strides = [1, 1]} : vector<136x128xf32> to vector<136x64xf32>
    %41 = arith.truncf %39 : vector<136x16xf32> to vector<136x16xbf16>
    %c0_18 = arith.constant 0 : index
    %c0_19 = arith.constant 0 : index
    %42 = vector.load %arg8[%c0_18, %c0_19] : memref<16x64xbf16, #tpu.memory_space<vmem>>, vector<16x64xbf16>
    %cst_20 = arith.constant dense<0.000000e+00> : vector<136x64xf32>
    %43 = tpu.matmul %41, %42, %cst_20 {dimension_numbers = #tpu.dot_dimension_numbers<[1], [0], [0], [1], [0, 0, 1, 1], [], []>} : vector<136x16xbf16>, vector<16x64xbf16>, vector<136x64xf32> -> vector<136x64xf32>
    %44 = arith.addf %40, %43 : vector<136x64xf32>
    %c0_21 = arith.constant 0 : index
    %c0_22 = arith.constant 0 : index
    %45 = vector.load %arg9[%c0_21, %c0_22] : memref<1x64xf32, #tpu.memory_space<vmem>>, vector<1x64xf32>
    %46 = vector.broadcast %45 : vector<1x64xf32> to vector<136x64xf32>
    %47 = arith.addf %44, %46 : vector<136x64xf32>
    %cst_23 = arith.constant 0.000000e+00 : f32
    %48 = vector.broadcast %cst_23 : f32 to vector<136x64xf32>
    %49 = arith.maximumf %47, %48 : vector<136x64xf32>
    %50 = arith.truncf %49 : vector<136x64xf32> to vector<136x64xbf16>
    %c0_24 = arith.constant 0 : index
    %c0_25 = arith.constant 0 : index
    %51 = vector.load %arg10[%c0_24, %c0_25] : memref<64x64xbf16, #tpu.memory_space<vmem>>, vector<64x64xbf16>
    %cst_26 = arith.constant dense<0.000000e+00> : vector<136x64xf32>
    %52 = tpu.matmul %50, %51, %cst_26 {dimension_numbers = #tpu.dot_dimension_numbers<[1], [0], [0], [1], [0, 0, 1, 1], [], []>} : vector<136x64xbf16>, vector<64x64xbf16>, vector<136x64xf32> -> vector<136x64xf32>
    %c0_27 = arith.constant 0 : index
    %c0_28 = arith.constant 0 : index
    %53 = vector.load %arg11[%c0_27, %c0_28] : memref<1x64xf32, #tpu.memory_space<vmem>>, vector<1x64xf32>
    %54 = vector.broadcast %53 : vector<1x64xf32> to vector<136x64xf32>
    %55 = arith.addf %52, %54 : vector<136x64xf32>
    %56 = vector.extract_strided_slice %55 {offsets = [0, 0], sizes = [136, 32], strides = [1, 1]} : vector<136x64xf32> to vector<136x32xf32>
    %57 = vector.extract_strided_slice %55 {offsets = [0, 32], sizes = [136, 32], strides = [1, 1]} : vector<136x64xf32> to vector<136x32xf32>
    %cst_29 = arith.constant 0.000000e+00 : f32
    %58 = vector.broadcast %cst_29 : f32 to vector<136x32xf32>
    %59 = arith.maximumf %57, %58 : vector<136x32xf32>
    %60 = math.absf %57 : vector<136x32xf32>
    %cst_30 = arith.constant 0.000000e+00 : f32
    %61 = vector.broadcast %cst_30 : f32 to vector<136x32xf32>
    %62 = arith.subf %61, %60 : vector<136x32xf32>
    %63 = math.exp %62 : vector<136x32xf32>
    %cst_31 = arith.constant 1.000000e+00 : f32
    %64 = vector.broadcast %cst_31 : f32 to vector<136x32xf32>
    %65 = arith.addf %64, %63 : vector<136x32xf32>
    %66 = math.log %65 : vector<136x32xf32>
    %67 = arith.addf %59, %66 : vector<136x32xf32>
    %c0_32 = arith.constant 0 : index
    %c0_33 = arith.constant 0 : index
    %68 = vector.load %arg3[%c0_32, %c0_33] : memref<136x32xf32, #tpu.memory_space<vmem>>, vector<136x32xf32>
    %cst_34 = arith.constant 1.000000e-10 : f32
    %69 = vector.broadcast %cst_34 : f32 to vector<136x32xf32>
    %70 = arith.addf %67, %69 : vector<136x32xf32>
    %71 = math.sqrt %70 : vector<136x32xf32>
    %72 = arith.mulf %68, %71 : vector<136x32xf32>
    %73 = arith.addf %56, %72 : vector<136x32xf32>
    %c0_35 = arith.constant 0 : index
    %c0_36 = arith.constant 0 : index
    %74 = vector.load %arg12[%c0_35, %c0_36] : memref<136x144xf32, #tpu.memory_space<vmem>>, vector<136x32xf32>
    tpu.vector_store %arg12[%c0_35, %c0_36], %56 {strides = array<i32>} : memref<136x144xf32, #tpu.memory_space<vmem>>, vector<136x32xf32>,
    %c0_37 = arith.constant 0 : index
    %c32 = arith.constant 32 : index
    %75 = vector.load %arg12[%c0_37, %c32] : memref<136x144xf32, #tpu.memory_space<vmem>>, vector<136x32xf32>
    tpu.vector_store %arg12[%c0_37, %c32], %67 {strides = array<i32>} : memref<136x144xf32, #tpu.memory_space<vmem>>, vector<136x32xf32>,
    %c0_38 = arith.constant 0 : index
    %c64 = arith.constant 64 : index
    %76 = vector.load %arg12[%c0_38, %c64] : memref<136x144xf32, #tpu.memory_space<vmem>>, vector<136x32xf32>
    tpu.vector_store %arg12[%c0_38, %c64], %73 {strides = array<i32>} : memref<136x144xf32, #tpu.memory_space<vmem>>, vector<136x32xf32>,
    %c0_39 = arith.constant 0 : index
    %c96 = arith.constant 96 : index
    %77 = vector.load %arg12[%c0_39, %c96] : memref<136x144xf32, #tpu.memory_space<vmem>>, vector<136x16xf32>
    tpu.vector_store %arg12[%c0_39, %c96], %15 {strides = array<i32>} : memref<136x144xf32, #tpu.memory_space<vmem>>, vector<136x16xf32>,
    %c0_40 = arith.constant 0 : index
    %c112 = arith.constant 112 : index
    %78 = vector.load %arg12[%c0_40, %c112] : memref<136x144xf32, #tpu.memory_space<vmem>>, vector<136x16xf32>
    tpu.vector_store %arg12[%c0_40, %c112], %25 {strides = array<i32>} : memref<136x144xf32, #tpu.memory_space<vmem>>, vector<136x16xf32>,
    %c0_41 = arith.constant 0 : index
    %c128 = arith.constant 128 : index
    %79 = vector.load %arg12[%c0_41, %c128] : memref<136x144xf32, #tpu.memory_space<vmem>>, vector<136x16xf32>
    tpu.vector_store %arg12[%c0_41, %c128], %39 {strides = array<i32>} : memref<136x144xf32, #tpu.memory_space<vmem>>, vector<136x16xf32>,
    return
  }
  func.func @transform_0(%arg0: i32) -> (i32, i32) {
    %c0_i32 = arith.constant 0 : i32
    %c0_i32_0 = arith.constant 0 : i32
    return %arg0, %c0_i32 : i32, i32
  }
  func.func @transform_1(%arg0: i32) -> (i32, i32) {
    %c0_i32 = arith.constant 0 : i32
    %c0_i32_0 = arith.constant 0 : i32
    return %arg0, %c0_i32 : i32, i32
  }
  func.func @transform_2(%arg0: i32) -> (i32, i32) {
    %c0_i32 = arith.constant 0 : i32
    %c0_i32_0 = arith.constant 0 : i32
    return %arg0, %c0_i32 : i32, i32
  }
  func.func @transform_3(%arg0: i32) -> (i32, i32) {
    %c0_i32 = arith.constant 0 : i32
    %c0_i32_0 = arith.constant 0 : i32
    %c0_i32_1 = arith.constant 0 : i32
    return %c0_i32, %c0_i32_0 : i32, i32
  }
  func.func @transform_4(%arg0: i32) -> (i32, i32) {
    %c0_i32 = arith.constant 0 : i32
    %c0_i32_0 = arith.constant 0 : i32
    %c0_i32_1 = arith.constant 0 : i32
    return %c0_i32, %c0_i32_0 : i32, i32
  }
  func.func @transform_5(%arg0: i32) -> (i32, i32) {
    %c0_i32 = arith.constant 0 : i32
    %c0_i32_0 = arith.constant 0 : i32
    %c0_i32_1 = arith.constant 0 : i32
    return %c0_i32, %c0_i32_0 : i32, i32
  }
  func.func @transform_6(%arg0: i32) -> (i32, i32) {
    %c0_i32 = arith.constant 0 : i32
    %c0_i32_0 = arith.constant 0 : i32
    %c0_i32_1 = arith.constant 0 : i32
    return %c0_i32, %c0_i32_0 : i32, i32
  }
  func.func @transform_7(%arg0: i32) -> (i32, i32) {
    %c0_i32 = arith.constant 0 : i32
    %c0_i32_0 = arith.constant 0 : i32
    %c0_i32_1 = arith.constant 0 : i32
    return %c0_i32, %c0_i32_0 : i32, i32
  }
  func.func @transform_8(%arg0: i32) -> (i32, i32) {
    %c0_i32 = arith.constant 0 : i32
    %c0_i32_0 = arith.constant 0 : i32
    %c0_i32_1 = arith.constant 0 : i32
    return %c0_i32, %c0_i32_0 : i32, i32
  }
  func.func @transform_9(%arg0: i32) -> (i32, i32) {
    %c0_i32 = arith.constant 0 : i32
    %c0_i32_0 = arith.constant 0 : i32
    %c0_i32_1 = arith.constant 0 : i32
    return %c0_i32, %c0_i32_0 : i32, i32
  }
  func.func @transform_10(%arg0: i32) -> (i32, i32) {
    %c0_i32 = arith.constant 0 : i32
    %c0_i32_0 = arith.constant 0 : i32
    %c0_i32_1 = arith.constant 0 : i32
    return %c0_i32, %c0_i32_0 : i32, i32
  }
  func.func @transform_11(%arg0: i32) -> (i32, i32) {
    %c0_i32 = arith.constant 0 : i32
    %c0_i32_0 = arith.constant 0 : i32
    return %arg0, %c0_i32 : i32, i32
  }
}

</mosaic_0001>

<bundles_post_ra>
// kernel: tpu_custom_call.1
= control target key start
LH: loop header
LB: loop body
LE: loop exit
PB: predicated region body
PF: predicated region fallthrough
CT: control target
= control target key end

     0   :  { %s2847_s17 = smov 0   ;;  %s4331_s0 = inlined_call_operand.vmem [shape: f32[272,64], index: 0, kind: input, shape index: {}]   ;;  %s4332_s1 = inlined_call_operand.vmem [shape: f32[272,16], index: 1, kind: input, shape index: {}]   ;;  %s4333_s2 = inlined_call_operand.vmem [shape: f32[272,32], index: 2, kind: input, shape index: {}]   ;;  %s4334_s3 = inlined_call_operand.vmem [shape: bf16[64,128], index: 3, kind: input, shape index: {}]   ;;  %s4335_s4 = inlined_call_operand.vmem [shape: f32[1,64], index: 4, kind: input, shape index: {}]   ;;  %s4336_s5 = inlined_call_operand.vmem [shape: bf16[64,16], index: 5, kind: input, shape index: {}]   ;;  %s4337_s6 = inlined_call_operand.vmem [shape: f32[1,16], index: 6, kind: input, shape index: {}]   ;;  %s4338_s7 = inlined_call_operand.vmem [shape: bf16[16,64], index: 7, kind: input, shape index: {}]   ;;  %s4339_s8 = inlined_call_operand.vmem [shape: f32[1,64], index: 8, kind: input, shape index: {}]   ;;  %s4340_s9 = inlined_call_operand.vmem [shape: bf16[64,64], index: 9, kind: input, shape index: {}]   ;;  %s4341_s10 = inlined_call_operand.vmem [shape: f32[1,64], index: 10, kind: input, shape index: {}]   ;;  %s4342_s11 = inlined_call_operand.vmem [shape: f32[272,144], index: 11, kind: output, shape index: {}]  }
   0x1 LB: > { %s2408_s18 = sadd.s32 4294967295, %s2782_s17   ;;  %p2412_p0 = scmp.ge.s32.totalorder %s2782_s17, 1  ;;  %s2782_s17 = sphi %s2847_s17, %s21_s17  }
   0x2   : > { %p360_p1 = scmp.lt.s32.totalorder %s2782_s17, 3 }
   0x4   : > { %p361_p2 = pnand %p2412_p0, %p360_p1 }
   0x6   : > { %364 = sbr.rel (%p361_p2) target bundleno = 1598 (0x63e), region = 64 }
   0xb   : > { %v2512_v0 = vld [vmem:[%s4334_s3 + $0x18] sm:$0xff]  ;;  %s411_s21 = smul.u32 17, %s2408_s18  ;;  %v2511_v1 = vld [vmem:[%s4334_s3 + $0x10] sm:$0xff]  ;;  %v2510_v2 = vld [vmem:[%s4334_s3 + $0x8] sm:$0xff]  ;;  %vm495_vm0 = vcmask 523264   ;;  %vm739_vm1 = vcmask 130048  }
   0xc   : > { %527 = vmatpush.bf16.msra.mxu0 %v2512_v0  ;;  %v2509_v3 = vld [vmem:[%s4334_s3] sm:$0xff]  ;;  %v2516_v24 = vld [vmem:[%s4336_s5 + $0x18] sm:$0xff]  ;;  %v2515_v26 = vld [vmem:[%s4336_s5 + $0x10] sm:$0xff]  ;;  %vm2015_vm2 = vcmask 261120   ;;  %vm2033_vm3 = vcmask 523520   ;;  %s2786_s15 = smov 112  }
   0xd   : > { %p412_p3 = scmp.lt.s32.totalorder %s411_s21, 33  ;;  %690 = vmatpush.bf16.msra.mxu1 %v2516_v24  ;;  %v2514_v27 = vld [vmem:[%s4336_s5 + $0x8] sm:$0xff]  ;;  %v2513_v28 = vld [vmem:[%s4336_s5] sm:$0xff] }
   0xe   : > { %v2916_v30 = vld [vmem:[%s4335_s4] ss:$0 sm:$0xff] }
   0xf   : > { %s4354_s21 = smov (!%p412_p3, %s411_s21), 33 }
  0x10   : > { %528 = vmatpush.bf16.msra.mxu0 %v2511_v1  ;;  %s2867_s26 = sshll.u32 %s4354_s21, 3  ;;  %s2508_s14 = sshll.u32 %s4354_s21, 4 }
  0x11   : > { %s2873_s29 = scalar_lea.vmem %s4331_s0, %s2867_s26  ;;  %691 = vmatpush.bf16.msra.mxu1 %v2515_v26  ;;  %s2995_s12 = scalar_lea.vmem %s4332_s1, %s2867_s26 }
  0x12   : > { %v437_v4 = vld [vmem:[%s2873_s29] sm:$0xff]  ;;  %v438_v5 = vld [vmem:[%s2873_s29 + $0x8] sm:$0xff]  ;;  %v439_v7 = vld [vmem:[%s2873_s29 + $0x10] sm:$0xff]  ;;  %s3205_s18 = scalar_lea.vmem %s4342_s11, %s2508_s14  ;;  %s2784_s21 = smov 64  }
  0x13   : > { %v454_v6 = vpack.c.bf16 %v438_v5, %v437_v4  ;;  %v440_v8 = vld [vmem:[%s2873_s29 + $0x18] sm:$0xff]  ;;  %v441_v10 = vld [vmem:[%s2873_s29 + $0x20] sm:$0xff]  ;;  %v442_v11 = vld [vmem:[%s2873_s29 + $0x28] sm:$0xff]  ;;  %s2785_s14 = smov 96   ;;  %s4131_s23 = scalar_lea.vmem %s4333_s2, %s2867_s26 }
  0x14   : > { %529 = vmatpush.bf16.msra.mxu0 %v2510_v2  ;;  %v455_v9 = vpack.c.bf16 %v440_v8, %v439_v7  ;;  %v456_v12 = vpack.c.bf16 %v442_v11, %v441_v10  ;;  %v443_v13 = vld [vmem:[%s2873_s29 + $0x30] sm:$0xff]  ;;  %v444_v14 = vld [vmem:[%s2873_s29 + $0x38] sm:$0xff]  ;;  %v445_v16 = vld [vmem:[%s2873_s29 + $0x40] sm:$0xff] }
  0x15   : > { %v457_v15 = vpack.c.bf16 %v444_v14, %v443_v13  ;;  %v446_v17 = vld [vmem:[%s2873_s29 + $0x48] sm:$0xff]  ;;  %v447_v19 = vld [vmem:[%s2873_s29 + $0x50] sm:$0xff]  ;;  %v448_v20 = vld [vmem:[%s2873_s29 + $0x58] sm:$0xff]  ;;  %692 = vmatpush.bf16.msra.mxu1 %v2514_v27 }
  0x16   : > { %v458_v18 = vpack.c.bf16 %v446_v17, %v445_v16  ;;  %v459_v21 = vpack.c.bf16 %v448_v20, %v447_v19  ;;  %v449_v22 = vld [vmem:[%s2873_s29 + $0x60] sm:$0xff]  ;;  %v450_v23 = vld [vmem:[%s2873_s29 + $0x68] sm:$0xff]  ;;  %v451_v33 = vld [vmem:[%s2873_s29 + $0x70] sm:$0xff] }
  0x17   : > { %v460_v25 = vpack.c.bf16 %v450_v23, %v449_v22  ;;  %v452_v34 = vld [vmem:[%s2873_s29 + $0x78] sm:$0xff]  ;;  %v927_v23 = vld [vmem:[%s2995_s12] sm:$0xff] }
  0x18   : > { %530 = vmatpush.bf16.msra.mxu0 %v2509_v3  ;;  %v461_v36 = vpack.c.bf16 %v452_v34, %v451_v33 }
  0x19   : > { %693 = vmatpush.bf16.msra.mxu1 %v2513_v28 }
  0x1b   : > { %2434 = vmatmul.msk.bf16.vlgmr.msra.gmra.mxu0 %vm495_vm0, %v454_v6 }
  0x2b   : > { %2435 = vmatmul.msk.bf16.gmra.mxu0 %vm495_vm0, %v455_v9 }
  0x3b   : > { %2436 = vmatmul.msk.bf16.gmra.mxu0 %vm495_vm0, %v456_v12 }
  0x4b   : > { %2437 = vmatmul.msk.bf16.gmra.mxu0 %vm495_vm0, %v457_v15 }
  0x5b   : > { %2438 = vmatmul.msk.bf16.gmra.mxu0 %vm495_vm0, %v458_v18  ;;  %v453_v18 = vld [vmem:[%s2873_s29 + $0x80] sm:$0xff] }
  0x5c   : > { %v462_v19 = vpack.c.bf16 %v453_v18, %v453_v18 }
  0x6b   : > { %2439 = vmatmul.msk.bf16.gmra.mxu0 %vm495_vm0, %v459_v21  ;;  %v2989_v21 = vld [vmem:[%s4337_s6] ss:$0 sm:$0xff] }
  0x7b   : > { %2440 = vmatmul.msk.bf16.gmra.mxu0 %vm495_vm0, %v460_v25 }
  0x8b   : > { %2441 = vmatmul.msk.bf16.gmra.mxu0 %vm495_vm0, %v461_v36  ;;  %v928_v36 = vld [vmem:[%s2995_s12 + $0x8] sm:$0xff] }
  0x98   : > { %v2911_v29 = vpop.f32.mrf.mxu0 }
  0x99   : > { %v580_v31 = vadd.f32 %v2916_v30, %v2911_v29 }
  0x9b   : > { %v597_v37 = vmax.f32 %v580_v31, 0.0  ;;  %2442 = vmatmul.msk.bf16.gmra.mxu0 %vm495_vm0, %v462_v19 }
  0xa0   : > { %v2920_v32 = vpop.f32.mrf.mxu0 }
  0xa1   : > { %v581_v35 = vadd.f32 %v2916_v30, %v2920_v32 }
  0xa3   : > { %v598_v38 = vmax.f32 %v581_v35, 0.0 }
  0xa5   : > { %v614_v39 = vpack.c.bf16 %v598_v38, %v597_v37 }
  0xa7   : > { %2459 = vmatmul.msk.bf16.vlgmr.msra.gmra.mxu1 %vm495_vm0, %v614_v39 }
  0xa8   : > { %v2928_v40 = vpop.f32.mrf.mxu0 }
  0xa9   : > { %v582_v41 = vadd.f32 %v2916_v30, %v2928_v40 }
  0xab   : > { %v599_v44 = vmax.f32 %v582_v41, 0.0 }
  0xb0   : > { %v2932_v42 = vpop.f32.mrf.mxu0 }
  0xb1   : > { %v583_v43 = vadd.f32 %v2916_v30, %v2932_v42 }
  0xb3   : > { %v600_v45 = vmax.f32 %v583_v43, 0.0 }
  0xb5   : > { %v615_v46 = vpack.c.bf16 %v600_v45, %v599_v44  ;;  %v929_v44 = vld [vmem:[%s2995_s12 + $0x10] sm:$0xff] }
  0xb7   : > { %2460 = vmatmul.msk.bf16.gmra.mxu1 %vm495_vm0, %v615_v46 }
  0xb8   : > { %v2937_v47 = vpop.f32.mrf.mxu0 }
  0xb9   : > { %v584_v48 = vadd.f32 %v2916_v30, %v2937_v47 }
  0xbb   : > { %v601_v50 = vmax.f32 %v584_v48, 0.0 }
  0xc0   : > { %v2941_v49 = vpop.f32.mrf.mxu0 }
  0xc1   : > { %v585_v51 = vadd.f32 %v2916_v30, %v2941_v49 }
  0xc3   : > { %v602_v52 = vmax.f32 %v585_v51, 0.0  ;;  %v930_v51 = vld [vmem:[%s2995_s12 + $0x18] sm:$0xff] }
  0xc5   : > { %v616_v53 = vpack.c.bf16 %v602_v52, %v601_v50 }
  0xc7   : > { %2461 = vmatmul.msk.bf16.gmra.mxu1 %vm495_vm0, %v616_v53 }
  0xc8   : > { %v2946_v54 = vpop.f32.mrf.mxu0 }
  0xc9   : > { %v586_v55 = vadd.f32 %v2916_v30, %v2946_v54 }
  0xcb   : > { %v603_v57 = vmax.f32 %v586_v55, 0.0 }
  0xd0   : > { %v2950_v56 = vpop.f32.mrf.mxu0 }
  0xd1   : > { %v587_v58 = vadd.f32 %v2916_v30, %v2950_v56 }
  0xd3   : > { %v604_v59 = vmax.f32 %v587_v58, 0.0  ;;  %v931_v58 = vld [vmem:[%s2995_s12 + $0x20] sm:$0xff] }
  0xd5   : > { %v617_v60 = vpack.c.bf16 %v604_v59, %v603_v57 }
  0xd7   : > { %2462 = vmatmul.msk.bf16.gmra.mxu1 %vm495_vm0, %v617_v60 }
  0xd8   : > { %v2955_v61 = vpop.f32.mrf.mxu0 }
  0xd9   : > { %v588_v62 = vadd.f32 %v2916_v30, %v2955_v61 }
  0xdb   : > { %v605_v0 = vmax.f32 %v588_v62, 0.0 }
  0xe0   : > { %v2959_v63 = vpop.f32.mrf.mxu0 }
  0xe1   : > { %v589_v1 = vadd.f32 %v2916_v30, %v2959_v63 }
  0xe3   : > { %v606_v2 = vmax.f32 %v589_v1, 0.0  ;;  %v932_v1 = vld [vmem:[%s2995_s12 + $0x28] sm:$0xff] }
  0xe5   : > { %v618_v3 = vpack.c.bf16 %v606_v2, %v605_v0 }
  0xe7   : > { %2463 = vmatmul.msk.bf16.gmra.mxu1 %vm495_vm0, %v618_v3 }
  0xe8   : > { %v2964_v4 = vpop.f32.mrf.mxu0 }
  0xe9   : > { %v590_v5 = vadd.f32 %v2916_v30, %v2964_v4 }
  0xeb   : > { %v607_v7 = vmax.f32 %v590_v5, 0.0 }
  0xf0   : > { %v2968_v6 = vpop.f32.mrf.mxu0 }
  0xf1   : > { %v591_v8 = vadd.f32 %v2916_v30, %v2968_v6 }
  0xf3   : > { %v608_v9 = vmax.f32 %v591_v8, 0.0  ;;  %v933_v8 = vld [vmem:[%s2995_s12 + $0x30] sm:$0xff] }
  0xf5   : > { %v619_v10 = vpack.c.bf16 %v608_v9, %v607_v7 }
  0xf7   : > { %2464 = vmatmul.msk.bf16.gmra.mxu1 %vm495_vm0, %v619_v10 }
  0xf8   : > { %v2973_v11 = vpop.f32.mrf.mxu0 }
  0xf9   : > { %v592_v12 = vadd.f32 %v2916_v30, %v2973_v11 }
  0xfb   : > { %v609_v14 = vmax.f32 %v592_v12, 0.0 }
 0x100   : > { %v2977_v13 = vpop.f32.mrf.mxu0 }
 0x101   : > { %v593_v15 = vadd.f32 %v2916_v30, %v2977_v13 }
 0x103   : > { %v610_v16 = vmax.f32 %v593_v15, 0.0  ;;  %v934_v15 = vld [vmem:[%s2995_s12 + $0x38] sm:$0xff] }
 0x105   : > { %v620_v17 = vpack.c.bf16 %v610_v16, %v609_v14 }
 0x107   : > { %2465 = vmatmul.msk.bf16.gmra.mxu1 %vm495_vm0, %v620_v17 }
 0x108   : > { %v2984_v20 = vpop.f32.mrf.mxu0 }
 0x109   : > { %v594_v25 = vadd.f32 %v2916_v30, %v2984_v20 }
 0x10b   : > { %v611_v31 = vmax.f32 %v594_v25, 0.0 }
 0x110   : > { %v3006_v27 = vpop.f32.mrf.mxu0 }
 0x111   : > { %v595_v33 = vadd.f32 %v2916_v30, %v3006_v27 }
 0x113   : > { %v612_v34 = vmax.f32 %v595_v33, 0.0 }
 0x115   : > { %v621_v38 = vpack.c.bf16 %v612_v34, %v611_v31 }
 0x117   : > { %2466 = vmatmul.msk.bf16.gmra.mxu1 %vm495_vm0, %v621_v38 }
 0x124   : > { %v695_v22 = vpop.f32.mrf.mxu1 }
 0x125   : > { %v2999_v24 = vadd.f32 %v2989_v21, %v695_v22  ;;  %v935_v22 = vld [vmem:[%s2995_s12 + $0x40] sm:$0xff] }
 0x127   : > { %v3004_v26 = vadd.f32 %v927_v23, %v2999_v24 }
 0x129   : > { %v961_v28 = vsel %vm739_vm1, %v3004_v26, -inf }
 0x12a   : > { %962 = vmax.xlane.f32.xlu0 %v961_v28 }
 0x12c   : > { %v697_v35 = vpop.f32.mrf.mxu1 }
 0x12d   : > { %v3014_v37 = vadd.f32 %v2989_v21, %v697_v35 }
 0x12f   : > { %v3017_v39 = vadd.f32 %v928_v36, %v3014_v37  ;;  %v3085_v36 = vpop.f32.mrf.mxu0 }
 0x130   : > { %v596_v38 = vadd.f32 %v2916_v30, %v3085_v36 }
 0x131   : > { %v964_v41 = vsel %vm739_vm1, %v3017_v39, -inf }
 0x132   : > { %965 = vmax.xlane.f32.xlu0 %v964_v41 }
 0x134   : > { %v700_v43 = vpop.f32.mrf.mxu1 }
 0x135   : > { %v3024_v45 = vadd.f32 %v2989_v21, %v700_v43  ;;  %v940_v43 = vld [vmem:[%s2995_s12 + $0x68] sm:$0xff] }
 0x137   : > { %v3027_v46 = vadd.f32 %v929_v44, %v3024_v45  ;;  %v613_v44 = vmax.f32 %v596_v38, 0.0  ;;  %v937_v38 = vld [vmem:[%s2995_s12 + $0x50] sm:$0xff] }
 0x139   : > { %v967_v48 = vsel %vm739_vm1, %v3027_v46, -inf }
 0x13a   : > { %968 = vmax.xlane.f32.xlu1 %v967_v48 }
 0x13c   : > { %v702_v50 = vpop.f32.mrf.mxu1 }
 0x13d   : > { %v3033_v52 = vadd.f32 %v2989_v21, %v702_v50  ;;  %v622_v50 = vpack.c.bf16 %v613_v44, %v613_v44 }
 0x13f   : > { %v3036_v53 = vadd.f32 %v930_v51, %v3033_v52  ;;  %2467 = vmatmul.msk.bf16.gmra.mxu1 %vm495_vm0, %v622_v50 }
 0x141   : > { %v970_v55 = vsel %vm739_vm1, %v3036_v53, -inf }
 0x142   : > { %971 = vmax.xlane.f32.xlu1 %v970_v55 }
 0x144   : > { %v705_v57 = vpop.f32.mrf.mxu1 }
 0x145   : > { %v3042_v59 = vadd.f32 %v2989_v21, %v705_v57  ;;  %v574_v57 = vpop.f32.mrf.mxu0 }
 0x147   : > { %v3045_v60 = vadd.f32 %v931_v58, %v3042_v59 }
 0x149   : > { %v973_v62 = vsel %vm739_vm1, %v3045_v60, -inf }
 0x14a   : > { %974 = vmax.xlane.f32.xlu2 %v973_v62 }
 0x14c   : > { %v707_v0 = vpop.f32.mrf.mxu1 }
 0x14d   : > { %v3051_v2 = vadd.f32 %v2989_v21, %v707_v0 }
 0x14f   : > { %v3054_v3 = vadd.f32 %v932_v1, %v3051_v2 }
 0x151   : > { %v976_v5 = vsel %vm739_vm1, %v3054_v3, -inf }
 0x152   : > { %977 = vmax.xlane.f32.xlu2 %v976_v5 }
 0x154   : > { %v710_v7 = vpop.f32.mrf.mxu1 }
 0x155   : > { %v3060_v9 = vadd.f32 %v2989_v21, %v710_v7 }
 0x157   : > { %v3063_v10 = vadd.f32 %v933_v8, %v3060_v9 }
 0x159   : > { %v979_v12 = vsel %vm739_vm1, %v3063_v10, -inf }
 0x15a   : > { %980 = vmax.xlane.f32.xlu0 %v979_v12 }
 0x15c   : > { %v712_v14 = vpop.f32.mrf.mxu1 }
 0x15d   : > { %v3069_v16 = vadd.f32 %v2989_v21, %v712_v14  ;;  %v936_v14 = vld [vmem:[%s2995_s12 + $0x48] sm:$0xff] }
 0x15f   : > { %v3072_v17 = vadd.f32 %v934_v15, %v3069_v16 }
 0x161   : > { %v982_v18 = vsel %vm739_vm1, %v3072_v17, -inf }
 0x162   : > { %983 = vmax.xlane.f32.xlu1 %v982_v18 }
 0x164   : > { %v715_v19 = vpop.f32.mrf.mxu1 }
 0x165   : > { %v3078_v23 = vadd.f32 %v2989_v21, %v715_v19 }
 0x167   : > { %v3081_v25 = vadd.f32 %v935_v22, %v3078_v23 }
 0x169   : > { %v985_v28 = vsel %vm739_vm1, %v3081_v25, -inf }
 0x16a   : > { %986 = vmax.xlane.f32.xlu1 %v985_v28 }
 0x16c   : > { %v717_v31 = vpop.f32.mrf.mxu1 }
 0x16d   : > { %v3104_v8 = vadd.f32 %v2989_v21, %v717_v31 }
 0x174   : > { %v720_v33 = vpop.f32.mrf.mxu1 }
 0x175   : > { %v3116_v22 = vadd.f32 %v2989_v21, %v720_v33 }
 0x17c   : > { %v722_v34 = vpop.f32.mrf.mxu1 }
 0x17d   : > { %v3130_v50 = vadd.f32 %v2989_v21, %v722_v34 }
 0x184   : > { %v725_v35 = vpop.f32.mrf.mxu1 }
 0x18c   : > { %v727_v41 = vpop.f32.mrf.mxu1 }
 0x18d   : > { %v3091_v48 = vadd.f32 %v2989_v21, %v727_v41 }
 0x18f   : > { %v3094_v51 = vadd.f32 %v940_v43, %v3091_v48 }
 0x191   : > { %v1000_v55 = vsel %vm739_vm1, %v3094_v51, -inf }
 0x192   : > { %1001 = vmax.xlane.f32.xlu1 %v1000_v55 }
 0x19d   : > { %v963_v58 = vpop.xlane.xlu0 %962 }
 0x19e   : > { %v1012_v30 = vsub.f32 %v3004_v26, %v963_v58  ;;  %v3110_v26 = vadd.f32 %v936_v14, %v3104_v8  ;;  %v938_v58 = vld [vmem:[%s2995_s12 + $0x58] sm:$0xff]  ;;  %v939_v14 = vld [vmem:[%s2995_s12 + $0x60] sm:$0xff] }
 0x1a0   : > { %v1029_v62 = vmul.f32 1.442695, %v1012_v30  ;;  %v988_v31 = vsel %vm739_vm1, %v3110_v26, -inf }
 0x1a2   : > { %2537 = vpow2.f32 %v1029_v62 }
 0x1a5   : > { %v966_v0 = vpop.xlane.xlu0 %965 }
 0x1a6   : > { %v1013_v1 = vsub.f32 %v3017_v39, %v966_v0 }
 0x1a8   : > { %v3101_v5 = vpop.eup %2537  ;;  %v1031_v7 = vmul.f32 1.442695, %v1013_v1  ;;  %v3144_v1 = vadd.f32 %v2989_v21, %v725_v35 }
 0x1a9   : > { %v1063_v12 = vsel %vm739_vm1, %v3101_v5, 0.0 }
 0x1aa   : > { %2539 = vpow2.f32 %v1031_v7  ;;  %1064 = vadd.xlane.f32.xlu2 %v1063_v12 }
 0x1ad   : > { %v969_v15 = vpop.xlane.xlu1 %968 }
 0x1ae   : > { %v1014_v18 = vsub.f32 %v3027_v46, %v969_v15  ;;  %v3124_v46 = vadd.f32 %v937_v38, %v3116_v22  ;;  %v730_v15 = vpop.f32.mrf.mxu1  ;;  %v941_v38 = vld [vmem:[%s2995_s12 + $0x70] sm:$0xff] }
 0x1af   : > { %v3156_v35 = vadd.f32 %v2989_v21, %v730_v15 }
 0x1b0   : > { %v3113_v39 = vpop.eup %2539  ;;  %v1033_v19 = vmul.f32 1.442695, %v1014_v18  ;;  %v991_v57 = vsel %vm739_vm1, %v3124_v46, -inf }
 0x1b1   : > { %v1066_v28 = vsel %vm739_vm1, %v3113_v39, 0.0 }
 0x1b2   : > { %2541 = vpow2.f32 %v1033_v19  ;;  %1067 = vadd.xlane.f32.xlu0 %v1066_v28  ;;  %989 = vmax.xlane.f32.xlu2 %v988_v31 }
 0x1b5   : > { %v972_v41 = vpop.xlane.xlu1 %971 }
 0x1b6   : > { %v1015_v43 = vsub.f32 %v3036_v53, %v972_v41  ;;  %v3138_v53 = vadd.f32 %v938_v58, %v3130_v50 }
 0x1b8   : > { %v3127_v44 = vpop.eup %2541  ;;  %v1035_v33 = vmul.f32 1.442695, %v1015_v43  ;;  %v994_v7 = vsel %vm739_vm1, %v3138_v53, -inf }
 0x1b9   : > { %v1069_v55 = vsel %vm739_vm1, %v3127_v44, 0.0 }
 0x1ba   : > { %2543 = vpow2.f32 %v1035_v33  ;;  %1070 = vadd.xlane.f32.xlu0 %v1069_v55  ;;  %992 = vmax.xlane.f32.xlu2 %v991_v57  ;;  %v3166_v33 = vadd.f32 %v941_v38, %v3156_v35 }
 0x1bc   : > { %v1003_v57 = vsel %vm739_vm1, %v3166_v33, -inf }
 0x1bd   : > { %v975_v30 = vpop.xlane.xlu2 %974 }
 0x1be   : > { %v1016_v62 = vsub.f32 %v3045_v60, %v975_v30  ;;  %v3152_v60 = vadd.f32 %v939_v14, %v3144_v1 }
 0x1c0   : > { %v3141_v0 = vpop.eup %2543  ;;  %v1037_v34 = vmul.f32 1.442695, %v1016_v62  ;;  %v997_v43 = vsel %vm739_vm1, %v3152_v60, -inf }
 0x1c1   : > { %v1072_v12 = vsel %vm739_vm1, %v3141_v0, 0.0 }
 0x1c2   : > { %2545 = vpow2.f32 %v1037_v34  ;;  %995 = vmax.xlane.f32.xlu0 %v994_v7  ;;  %1073 = vadd.xlane.f32.xlu1 %v1072_v12  ;;  %v732_v34 = vpop.f32.mrf.mxu1 }
 0x1c3   : > { %v3177_v14 = vadd.f32 %v2989_v21, %v732_v34 }
 0x1c5   : > { %v978_v18 = vpop.xlane.xlu2 %977 }
 0x1c6   : > { %v1017_v19 = vsub.f32 %v3054_v3, %v978_v18  ;;  %v942_v18 = vld [vmem:[%s2995_s12 + $0x78] sm:$0xff] }
 0x1c8   : > { %v3158_v28 = vpop.eup %2545  ;;  %v1039_v31 = vmul.f32 1.442695, %v1017_v19 }
 0x1c9   : > { %v1075_v41 = vsel %vm739_vm1, %v3158_v28, 0.0 }
 0x1ca   : > { %2547 = vpow2.f32 %v1039_v31  ;;  %1076 = vadd.xlane.f32.xlu1 %v1075_v41  ;;  %998 = vmax.xlane.f32.xlu0 %v997_v43  ;;  %v3185_v31 = vadd.f32 %v942_v18, %v3177_v14 }
 0x1cd   : > { %v981_v3 = vpop.xlane.xlu0 %980 }
 0x1ce   : > { %v1018_v55 = vsub.f32 %v3063_v10, %v981_v3 }
 0x1d0   : > { %v3171_v58 = vpop.eup %2547  ;;  %v1041_v30 = vmul.f32 1.442695, %v1018_v55 }
 0x1d1   : > { %v1078_v62 = vsel %vm739_vm1, %v3171_v58, 0.0 }
 0x1d2   : > { %2549 = vpow2.f32 %v1041_v30  ;;  %1079 = vadd.xlane.f32.xlu2 %v1078_v62  ;;  %1004 = vmax.xlane.f32.xlu1 %v1003_v57  ;;  %v735_v62 = vpop.f32.mrf.mxu1 }
 0x1d5   : > { %v984_v7 = vpop.xlane.xlu1 %983 }
 0x1d6   : > { %v1019_v12 = vsub.f32 %v3072_v17, %v984_v7  ;;  %v1006_v17 = vsel %vm739_vm1, %v3185_v31, -inf }
 0x1d8   : > { %v3179_v10 = vpop.eup %2549  ;;  %v1043_v15 = vmul.f32 1.442695, %v1019_v12 }
 0x1d9   : > { %v1081_v19 = vsel %vm739_vm1, %v3179_v10, 0.0 }
 0x1da   : > { %2551 = vpow2.f32 %v1043_v15  ;;  %1082 = vadd.xlane.f32.xlu2 %v1081_v19  ;;  %v737_v34 = vpop.f32.mrf.mxu1 }
 0x1dd   : > { %v987_v38 = vpop.xlane.xlu1 %986 }
 0x1de   : > { %v1020_v41 = vsub.f32 %v3081_v25, %v987_v38  ;;  %v2517_v25 = vld [vmem:[%s4338_s7] sm:$0xff] }
 0x1df   : > { %1199 = vmatpush.bf16.msra.mxu2 %v2517_v25 }
 0x1e0   : > { %v3190_v43 = vpop.eup %2551  ;;  %v1045_v3 = vmul.f32 1.442695, %v1020_v41 }
 0x1e1   : > { %v1084_v55 = vsel %vm739_vm1, %v3190_v43, 0.0 }
 0x1e2   : > { %2553 = vpow2.f32 %v1045_v3  ;;  %1085 = vadd.xlane.f32.xlu0 %v1084_v55  ;;  %1007 = vmax.xlane.f32.xlu2 %v1006_v17 }
 0x1e8   : > { %v3194_v57 = vpop.eup %2553 }
 0x1e9   : > { %v1087_v30 = vsel %vm739_vm1, %v3194_v57, 0.0 }
 0x1ea   : > { %1088 = vadd.xlane.f32.xlu0 %v1087_v30 }
 0x205   : > { %v1002_v3 = vpop.xlane.xlu1 %1001 }
 0x21d   : > { %v1065_v7 = vpop.xlane.xlu2 %1064 }
 0x21e   : > { %2555 = vrcp.f32 %v1065_v7  ;;  %v3214_v7 = vadd.f32 %v2989_v21, %v735_v62 }
 0x224   : > { %v2556_v12 = vpop.eup %2555 }
 0x225   : > { %v1068_v15 = vpop.xlane.xlu0 %1067  ;;  %v990_v18 = vpop.xlane.xlu2 %989  ;;  %v1131_v19 = vmul.f32 %v2556_v12, %v3101_v5 }
 0x226   : > { %2557 = vrcp.f32 %v1068_v15  ;;  %v1021_v38 = vsub.f32 %v3110_v26, %v990_v18  ;;  %v943_v15 = vld [vmem:[%s2995_s12 + $0x80] sm:$0xff] }
 0x227   : > { %2309 = vst.msk [vmem:[%s3205_s18 + $0x8] sm:$0xff] %vm739_vm1, %v1131_v19 }
 0x228   : > { %v1047_v41 = vmul.f32 1.442695, %v1021_v38 }
 0x22a   : > { %2559 = vpow2.f32 %v1047_v41 }
 0x22c   : > { %v2558_v17 = vpop.eup %2557 }
 0x22d   : > { %v1071_v55 = vpop.xlane.xlu0 %1070  ;;  %v993_v30 = vpop.xlane.xlu2 %992  ;;  %v1132_v25 = vmul.f32 %v2558_v17, %v3113_v39  ;;  %v3225_v39 = vadd.f32 %v943_v15, %v3214_v7 }
 0x22e   : > { %2561 = vrcp.f32 %v1071_v55  ;;  %v1022_v34 = vsub.f32 %v3124_v46, %v993_v30  ;;  %v1025_v55 = vsub.f32 %v3094_v51, %v1002_v3 }
 0x22f   : > { %v1148_v5 = vpack.c.bf16 %v1132_v25, %v1131_v19  ;;  %2310 = vst.msk [vmem:[%s3205_s18 + $0x18] sm:$0xff] %vm739_vm1, %v1132_v25  ;;  %v1009_v41 = vsel %vm739_vm1, %v3225_v39, -inf }
 0x230   : > { %v3218_v26 = vpop.eup %2559  ;;  %v1049_v12 = vmul.f32 1.442695, %v1022_v34 }
 0x231   : > { %2472 = vmatmul.msk.bf16.vlgmr.msra.gmra.mxu2 %vm739_vm1, %v1148_v5  ;;  %v1090_v18 = vsel %vm739_vm1, %v3218_v26, 0.0 }
 0x232   : > { %2563 = vpow2.f32 %v1049_v12  ;;  %1091 = vadd.xlane.f32.xlu1 %v1090_v18 }
 0x234   : > { %v2562_v21 = vpop.eup %2561 }
 0x235   : > { %v996_v46 = vpop.xlane.xlu0 %995  ;;  %v1074_v62 = vpop.xlane.xlu1 %1073  ;;  %v1133_v19 = vmul.f32 %v2562_v21, %v3127_v44 }
 0x236   : > { %v1023_v38 = vsub.f32 %v3138_v53, %v996_v46  ;;  %2565 = vrcp.f32 %v1074_v62  ;;  %v1055_v53 = vmul.f32 1.442695, %v1025_v55 }
 0x237   : > { %2311 = vst.msk [vmem:[%s3205_s18 + $0x28] sm:$0xff] %vm739_vm1, %v1133_v19 }
 0x238   : > { %v3233_v17 = vpop.eup %2563  ;;  %v1051_v30 = vmul.f32 1.442695, %v1023_v38 }
 0x239   : > { %v1093_v25 = vsel %vm739_vm1, %v3233_v17, 0.0 }
 0x23a   : > { %2567 = vpow2.f32 %v1051_v30  ;;  %1094 = vadd.xlane.f32.xlu2 %v1093_v25  ;;  %1010 = vmax.xlane.f32.xlu1 %v1009_v41 }
 0x23c   : > { %v2566_v44 = vpop.eup %2565 }
 0x23d   : > { %v1077_v34 = vpop.xlane.xlu1 %1076  ;;  %v999_v5 = vpop.xlane.xlu0 %998  ;;  %v1134_v12 = vmul.f32 %v2566_v44, %v3141_v0 }
 0x23e   : > { %2569 = vrcp.f32 %v1077_v34  ;;  %v1024_v15 = vsub.f32 %v3152_v60, %v999_v5 }
 0x23f   : > { %v1149_v18 = vpack.c.bf16 %v1134_v12, %v1133_v19  ;;  %2312 = vst.msk [vmem:[%s3205_s18 + $0x38] sm:$0xff] %vm739_vm1, %v1134_v12  ;;  %2571 = vpow2.f32 %v1055_v53 }
 0x240   : > { %v3242_v51 = vpop.eup %2567  ;;  %v1053_v3 = vmul.f32 1.442695, %v1024_v15 }
 0x241   : > { %2473 = vmatmul.msk.bf16.gmra.mxu2 %vm739_vm1, %v1149_v18  ;;  %v1096_v21 = vsel %vm739_vm1, %v3242_v51, 0.0 }
 0x242   : > { %2573 = vpow2.f32 %v1053_v3  ;;  %1097 = vadd.xlane.f32.xlu0 %v1096_v21 }
 0x244   : > { %v2570_v46 = vpop.eup %2569 }
 0x245   : > { %v1080_v0 = vpop.xlane.xlu2 %1079  ;;  %v1005_v62 = vpop.xlane.xlu1 %1004  ;;  %v1135_v60 = vmul.f32 %v2570_v46, %v3158_v28 }
 0x246   : > { %v3248_v19 = vpop.eup %2571  ;;  %2575 = vrcp.f32 %v1080_v0  ;;  %v1026_v38 = vsub.f32 %v3166_v33, %v1005_v62 }
 0x247   : > { %2313 = vst.msk [vmem:[%s3205_s18 + $0x48] sm:$0xff] %vm739_vm1, %v1135_v60  ;;  %v1102_v30 = vsel %vm739_vm1, %v3248_v19, 0.0 }
 0x248   : > { %v3253_v41 = vpop.eup %2573  ;;  %v1057_v55 = vmul.f32 1.442695, %v1026_v38 }
 0x249   : > { %v1099_v25 = vsel %vm739_vm1, %v3253_v41, 0.0 }
 0x24a   : > { %2577 = vpow2.f32 %v1057_v55  ;;  %1103 = vadd.xlane.f32.xlu0 %v1102_v30  ;;  %1100 = vadd.xlane.f32.xlu2 %v1099_v25 }
 0x24c   : > { %v2576_v28 = vpop.eup %2575 }
 0x24d   : > { %v1083_v44 = vpop.xlane.xlu2 %1082  ;;  %v1136_v53 = vmul.f32 %v2576_v28, %v3171_v58 }
 0x24e   : > { %2579 = vrcp.f32 %v1083_v44 }
 0x24f   : > { %v1150_v33 = vpack.c.bf16 %v1136_v53, %v1135_v60  ;;  %2314 = vst.msk [vmem:[%s3205_s18 + $0x58] sm:$0xff] %vm739_vm1, %v1136_v53 }
 0x250   : > { %v3262_v34 = vpop.eup %2577 }
 0x251   : > { %2474 = vmatmul.msk.bf16.gmra.mxu2 %vm739_vm1, %v1150_v33  ;;  %v1105_v5 = vsel %vm739_vm1, %v3262_v34, 0.0 }
 0x252   : > { %1106 = vadd.xlane.f32.xlu1 %v1105_v5 }
 0x254   : > { %v2580_v12 = vpop.eup %2579 }
 0x255   : > { %v1086_v15 = vpop.xlane.xlu0 %1085  ;;  %v1008_v18 = vpop.xlane.xlu2 %1007  ;;  %v1137_v3 = vmul.f32 %v2580_v12, %v3179_v10 }
 0x256   : > { %2581 = vrcp.f32 %v1086_v15  ;;  %v1027_v58 = vsub.f32 %v3185_v31, %v1008_v18 }
 0x257   : > { %2315 = vst.msk [vmem:[%s3205_s18 + $0x68] sm:$0xff] %vm739_vm1, %v1137_v3 }
 0x258   : > { %v1059_v21 = vmul.f32 1.442695, %v1027_v58 }
 0x25a   : > { %2583 = vpow2.f32 %v1059_v21 }
 0x25c   : > { %v2582_v46 = vpop.eup %2581 }
 0x25d   : > { %v1089_v0 = vpop.xlane.xlu0 %1088  ;;  %v1138_v62 = vmul.f32 %v2582_v46, %v3190_v43 }
 0x25e   : > { %2585 = vrcp.f32 %v1089_v0 }
 0x25f   : > { %v1151_v60 = vpack.c.bf16 %v1138_v62, %v1137_v3  ;;  %2316 = vst.msk [vmem:[%s3205_s18 + $0x78] sm:$0xff] %vm739_vm1, %v1138_v62 }
 0x260   : > { %v3274_v38 = vpop.eup %2583 }
 0x261   : > { %2475 = vmatmul.msk.bf16.gmra.mxu2 %vm739_vm1, %v1151_v60  ;;  %v1108_v10 = vsel %vm739_vm1, %v3274_v38, 0.0 }
 0x262   : > { %1109 = vadd.xlane.f32.xlu2 %v1108_v10 }
 0x264   : > { %v2586_v31 = vpop.eup %2585 }
 0x265   : > { %v1139_v55 = vmul.f32 %v2586_v31, %v3194_v57 }
 0x267   : > { %2317 = vst.msk [vmem:[%s3205_s18 + $0x88] sm:$0xff] %vm739_vm1, %v1139_v55 }
 0x2a5   : > { %v1092_v30 = vpop.xlane.xlu1 %1091 }
 0x2a6   : > { %2587 = vrcp.f32 %v1092_v30 }
 0x2ac   : > { %v2588_v43 = vpop.eup %2587 }
 0x2ad   : > { %v1095_v25 = vpop.xlane.xlu2 %1094  ;;  %v1011_v28 = vpop.xlane.xlu1 %1010  ;;  %v1140_v44 = vmul.f32 %v2588_v43, %v3218_v26 }
 0x2ae   : > { %2589 = vrcp.f32 %v1095_v25  ;;  %v1028_v53 = vsub.f32 %v3225_v39, %v1011_v28 }
 0x2af   : > { %v1152_v33 = vpack.c.bf16 %v1140_v44, %v1139_v55  ;;  %2318 = vst.msk [vmem:[%s3205_s18 + $0x98] sm:$0xff] %vm739_vm1, %v1140_v44 }
 0x2b0   : > { %v1061_v5 = vmul.f32 1.442695, %v1028_v53 }
 0x2b1   : > { %2476 = vmatmul.msk.bf16.gmra.mxu2 %vm739_vm1, %v1152_v33 }
 0x2b2   : > { %2591 = vpow2.f32 %v1061_v5 }
 0x2b4   : > { %v2590_v57 = vpop.eup %2589  ;;  %v1201_v12 = vpop.f32.mrf.mxu2 }
 0x2b5   : > { %v1098_v15 = vpop.xlane.xlu0 %1097  ;;  %1262 = vrot.lane.b32.xlu1 %v1201_v12, %s2784_s21  ;;  %v1141_v18 = vmul.f32 %v2590_v57, %v3233_v17 }
 0x2b6   : > { %2593 = vrcp.f32 %v1098_v15  ;;  %v743_v15 = vsel %vm739_vm1, %v3014_v37, -inf }
 0x2b7   : > { %2319 = vst.msk [vmem:[%s3205_s18 + $0xa8] sm:$0xff] %vm739_vm1, %v1141_v18 }
 0x2b8   : > { %v2592_v26 = vpop.eup %2591 }
 0x2b9   : > { %v1111_v39 = vsel %vm739_vm1, %v2592_v26, 0.0 }
 0x2ba   : > { %1112 = vadd.xlane.f32.xlu0 %v1111_v39 }
 0x2bc   : > { %v2594_v3 = vpop.eup %2593  ;;  %v1203_v58 = vpop.f32.mrf.mxu2 }
 0x2bd   : > { %v1104_v21 = vpop.xlane.xlu0 %1103  ;;  %1264 = vrot.lane.b32.xlu2 %v1203_v58, %s2784_s21  ;;  %v1101_v46 = vpop.xlane.xlu2 %1100  ;;  %v1142_v0 = vmul.f32 %v2594_v3, %v3242_v51  ;;  %v2535_v51 = vld [vmem:[%s4339_s8] ss:$0 sm:$0xff] }
 0x2be   : > { %2595 = vrcp.f32 %v1104_v21 }
 0x2bf   : > { %2597 = vrcp.f32 %v1101_v46  ;;  %v1153_v17 = vpack.c.bf16 %v1142_v0, %v1141_v18  ;;  %2320 = vst.msk [vmem:[%s3205_s18 + $0xb8] sm:$0xff] %vm739_vm1, %v1142_v0  ;;  %v752_v18 = vsel %vm739_vm1, %v3042_v59, -inf }
 0x2c1   : > { %2477 = vmatmul.msk.bf16.gmra.mxu2 %vm739_vm1, %v1153_v17 }
 0x2c4   : > { %v2596_v62 = vpop.eup %2595  ;;  %v1206_v60 = vpop.f32.mrf.mxu2 }
 0x2c5   : > { %v2598_v10 = vpop.eup %2597  ;;  %1266 = vrot.lane.b32.xlu2 %v1206_v60, %s2784_s21  ;;  %v1107_v31 = vpop.xlane.xlu1 %1106  ;;  %v1144_v55 = vmul.f32 %v2596_v62, %v3248_v19 }
 0x2c6   : > { %2599 = vrcp.f32 %v1107_v31  ;;  %v1143_v30 = vmul.f32 %v2598_v10, %v3253_v41 }
 0x2c7   : > { %2322 = vst.msk [vmem:[%s3205_s18 + $0xd8] sm:$0xff] %vm739_vm1, %v1144_v55 }
 0x2c8   : > { %2321 = vst.msk [vmem:[%s3205_s18 + $0xc8] sm:$0xff] %vm739_vm1, %v1143_v30  ;;  %v1154_v19 = vpack.c.bf16 %v1144_v55, %v1143_v30 }
 0x2cc   : > { %v2600_v43 = vpop.eup %2599  ;;  %v1208_v25 = vpop.f32.mrf.mxu2 }
 0x2cd   : > { %1268 = vrot.lane.b32.xlu1 %v1208_v25, %s2784_s21  ;;  %v1145_v28 = vmul.f32 %v2600_v43, %v3262_v34 }
 0x2ce   : > { %1333 = vrot.lane.b32.xlu0 %v2535_v51, %s2784_s21 }
 0x2cf   : > { %2323 = vst.msk [vmem:[%s3205_s18 + $0xe8] sm:$0xff] %vm739_vm1, %v1145_v28 }
 0x2d1   : > { %2478 = vmatmul.msk.bf16.gmra.mxu2 %vm739_vm1, %v1154_v19 }
 0x2d4   : > { %v1211_v41 = vpop.f32.mrf.mxu2 }
 0x2d5   : > { %v1110_v44 = vpop.xlane.xlu2 %1109 }
 0x2d6   : > { %2601 = vrcp.f32 %v1110_v44  ;;  %1270 = vrot.lane.b32.xlu0 %v1211_v41, %s2784_s21  ;;  %v770_v41 = vsel %vm739_vm1, %v3116_v22, -inf }
 0x2dc   : > { %v2602_v53 = vpop.eup %2601  ;;  %v1213_v33 = vpop.f32.mrf.mxu2 }
 0x2dd   : > { %1272 = vrot.lane.b32.xlu2 %v1213_v33, %s2784_s21  ;;  %v1146_v5 = vmul.f32 %v2602_v53, %v3274_v38  ;;  %v761_v38 = vsel %vm739_vm1, %v3069_v16, -inf }
 0x2df   : > { %v1155_v57 = vpack.c.bf16 %v1146_v5, %v1145_v28  ;;  %2324 = vst.msk [vmem:[%s3205_s18 + $0xf8] sm:$0xff] %vm739_vm1, %v1146_v5 }
 0x2e1   : > { %2479 = vmatmul.msk.bf16.gmra.mxu2 %vm739_vm1, %v1155_v57 }
 0x2e4   : > { %v1216_v34 = vpop.f32.mrf.mxu2 }
 0x2e5   : > { %1274 = vrot.lane.b32.xlu0 %v1216_v34, %s2784_s21 }
 0x2ec   : > { %v1218_v12 = vpop.f32.mrf.mxu2 }
 0x2ed   : > { %1276 = vrot.lane.b32.xlu2 %v1218_v12, %s2784_s21 }
 0x2f7   : > { %744 = vmax.xlane.f32.xlu1 %v743_v15 }
 0x2ff   : > { %753 = vmax.xlane.f32.xlu1 %v752_v18 }
 0x307   : > { %762 = vmax.xlane.f32.xlu1 %v761_v38 }
 0x317   : > { %v1265_v0 = vpop.permute.xlu2 %1264 }
 0x318   : > { %v1314_v60 = vadd.f32 %v1265_v0, %v2920_v32 }
 0x31f   : > { %v1267_v53 = vpop.permute.xlu2 %1266 }
 0x320   : > { %v1315_v5 = vadd.f32 %v1267_v53, %v2928_v40 }
 0x327   : > { %v1263_v17 = vpop.permute.xlu1 %1262 }
 0x328   : > { %v1313_v10 = vadd.f32 %v1263_v17, %v2911_v29 }
 0x32d   : > { %v1113_v39 = vpop.xlane.xlu0 %1112 }
 0x32e   : > { %2603 = vrcp.f32 %v1113_v39 }
 0x334   : > { %v2604_v3 = vpop.eup %2603  ;;  %v1221_v58 = vpop.f32.mrf.mxu2 }
 0x335   : > { %1278 = vrot.lane.b32.xlu0 %v1221_v58, %s2784_s21  ;;  %v1147_v21 = vmul.f32 %v2604_v3, %v2592_v26  ;;  %v746_v3 = vsel %vm739_vm1, %v3024_v45, -inf }
 0x337   : > { %v1156_v46 = vpack.c.bf16 %v1147_v21, %v1147_v21  ;;  %2325 = vst.msk [vmem:[%s3205_s18 + $0x108] sm:$0xff] %vm739_vm1, %v1147_v21  ;;  %v1273_v15 = vpop.permute.xlu2 %1272 }
 0x338   : > { %v1318_v58 = vadd.f32 %v1273_v15, %v2941_v49  ;;  %v2520_v49 = vld [vmem:[%s4340_s9 + $0x10] sm:$0xff] }
 0x339   : > { %2480 = vmatmul.msk.bf16.gmra.mxu2 %vm739_vm1, %v1156_v46 }
 0x33c   : > { %v1223_v62 = vpop.f32.mrf.mxu2 }
 0x33d   : > { %1280 = vrot.lane.b32.xlu2 %v1223_v62, %s2784_s21 }
 0x33f   : > { %v1269_v44 = vpop.permute.xlu1 %1268 }
 0x340   : > { %v3334_v31 = vpop.permute.xlu0 %1333  ;;  %v1316_v33 = vadd.f32 %v1269_v44, %v2932_v42 }
 0x341   : > { %v1336_v55 = vadd.f32 %v3334_v31, %v1313_v10  ;;  %v1337_v26 = vadd.f32 %v3334_v31, %v1314_v60  ;;  %v1338_v57 = vadd.f32 %v3334_v31, %v1315_v5  ;;  %v1341_v46 = vadd.f32 %v3334_v31, %v1318_v58 }
 0x342   : > { %v1339_v34 = vadd.f32 %v3334_v31, %v1316_v33  ;;  %v740_v10 = vsel %vm739_vm1, %v2999_v24, -inf }
 0x343   : > { %v1353_v30 = vmax.f32 %v1336_v55, 0.0  ;;  %v1354_v51 = vmax.f32 %v1337_v26, 0.0  ;;  %v1355_v38 = vmax.f32 %v1338_v57, 0.0  ;;  %v1358_v55 = vmax.f32 %v1341_v46, 0.0 }
 0x344   : > { %v1226_v43 = vpop.f32.mrf.mxu2  ;;  %v1356_v39 = vmax.f32 %v1339_v34, 0.0 }
 0x345   : > { %1282 = vrot.lane.b32.xlu0 %v1226_v43, %s2784_s21  ;;  %v1370_v25 = vpack.c.bf16 %v1354_v51, %v1353_v30 }
 0x346   : > { %v1371_v21 = vpack.c.bf16 %v1356_v39, %v1355_v38 }
 0x347   : > { %1400 = vrot.lane.b32.xlu1 %v1370_v25, %s2784_s21  ;;  %v1277_v0 = vpop.permute.xlu2 %1276 }
 0x348   : > { %v1271_v12 = vpop.permute.xlu0 %1270  ;;  %v1320_v60 = vadd.f32 %v1277_v0, %v2950_v56  ;;  %v2518_v56 = vld [vmem:[%s4340_s9] sm:$0xff] }
 0x349   : > { %v1317_v18 = vadd.f32 %v1271_v12, %v2937_v47  ;;  %v2521_v47 = vld [vmem:[%s4340_s9 + $0x18] sm:$0xff] }
 0x34a   : > { %1473 = vmatpush.bf16.msra.mxu3 %v2521_v47  ;;  %v1343_v51 = vadd.f32 %v3334_v31, %v1320_v60 }
 0x34b   : > { %v1340_v42 = vadd.f32 %v3334_v31, %v1317_v18 }
 0x34c   : > { %v1228_v28 = vpop.f32.mrf.mxu2  ;;  %v1360_v25 = vmax.f32 %v1343_v51, 0.0  ;;  %v779_v51 = vsel %vm739_vm1, %v3091_v48, -inf }
 0x34d   : > { %1284 = vrot.lane.b32.xlu2 %v1228_v28, %s2784_s21  ;;  %v1357_v17 = vmax.f32 %v1340_v42, 0.0 }
 0x34e   : > { %1474 = vmatpush.bf16.msra.mxu3 %v2520_v49 }
 0x34f   : > { %v1372_v30 = vpack.c.bf16 %v1358_v55, %v1357_v17  ;;  %v776_v17 = vsel %vm739_vm1, %v3144_v1, -inf }
 0x354   : > { %v1231_v32 = vpop.f32.mrf.mxu2 }
 0x355   : > { %1286 = vrot.lane.b32.xlu0 %v1231_v32, %s2784_s21 }
 0x357   : > { %v1275_v40 = vpop.permute.xlu0 %1274 }
 0x358   : > { %v1319_v62 = vadd.f32 %v1275_v40, %v2946_v54  ;;  %v2519_v54 = vld [vmem:[%s4340_s9 + $0x8] sm:$0xff] }
 0x359   : > { %1475 = vmatpush.bf16.msra.mxu3 %v2519_v54 }
 0x35a   : > { %v1342_v26 = vadd.f32 %v3334_v31, %v1319_v62 }
 0x35c   : > { %v1233_v29 = vpop.f32.mrf.mxu2  ;;  %v1359_v43 = vmax.f32 %v1342_v26, 0.0  ;;  %v749_v26 = vsel %vm739_vm1, %v3033_v52, -inf }
 0x35d   : > { %1288 = vrot.lane.b32.xlu2 %v1233_v29, %s2784_s21  ;;  %1476 = vmatpush.bf16.msra.mxu3 %v2518_v56 }
 0x35e   : > { %v1373_v28 = vpack.c.bf16 %v1360_v25, %v1359_v43  ;;  %v764_v25 = vsel %vm739_vm1, %v3078_v23, -inf }
 0x364   : > { %v1236_v19 = vpop.f32.mrf.mxu2 }
 0x365   : > { %1290 = vrot.lane.b32.xlu0 %v1236_v19, %s2784_s21 }
 0x36a   : > { %v3377_v32 = vpop.xlane.xlu1 %744 }
 0x36c   : > { %v1238_v29 = vpop.f32.mrf.mxu2 }
 0x371   : > { %771 = vmax.xlane.f32.xlu1 %v770_v41 }
 0x372   : > { %v3381_v44 = vpop.xlane.xlu1 %753 }
 0x37a   : > { %v3387_v18 = vpop.xlane.xlu1 %762 }
 0x386   : > { %747 = vmax.xlane.f32.xlu2 %v746_v3 }
 0x38a   : > { %1402 = vrot.lane.b32.xlu1 %v1371_v21, %s2784_s21 }
 0x38f   : > { %741 = vmax.xlane.f32.xlu0 %v740_v10 }
 0x392   : > { %1404 = vrot.lane.b32.xlu1 %v1372_v30, %s2784_s21 }
 0x397   : > { %v1281_v19 = vpop.permute.xlu2 %1280 }
 0x398   : > { %v1322_v41 = vadd.f32 %v1281_v19, %v2959_v63 }
 0x39a   : > { %1406 = vrot.lane.b32.xlu1 %v1373_v28, %s2784_s21  ;;  %v1345_v33 = vadd.f32 %v3334_v31, %v1322_v41 }
 0x39c   : > { %v1362_v34 = vmax.f32 %v1345_v33, 0.0 }
 0x39e   : > { %1292 = vrot.lane.b32.xlu2 %v1238_v29, %s2784_s21 }
 0x3a7   : > { %v1279_v53 = vpop.permute.xlu0 %1278  ;;  %v1285_v38 = vpop.permute.xlu2 %1284 }
 0x3a8   : > { %v1321_v5 = vadd.f32 %v1279_v53, %v2955_v61  ;;  %v1324_v39 = vadd.f32 %v1285_v38, %v2968_v6  ;;  %v758_v6 = vsel %vm739_vm1, %v3060_v9, -inf  ;;  %v773_v53 = vsel %vm739_vm1, %v3130_v50, -inf }
 0x3aa   : > { %v1344_v57 = vadd.f32 %v3334_v31, %v1321_v5  ;;  %v1347_v3 = vadd.f32 %v3334_v31, %v1324_v39 }
 0x3ac   : > { %v1361_v12 = vmax.f32 %v1344_v57, 0.0  ;;  %v1364_v21 = vmax.f32 %v1347_v3, 0.0 }
 0x3ae   : > { %v1374_v15 = vpack.c.bf16 %v1362_v34, %v1361_v12 }
 0x3b0   : > { %1408 = vrot.lane.b32.xlu1 %v1374_v15, %s2784_s21 }
 0x3b7   : > { %v1283_v63 = vpop.permute.xlu0 %1282  ;;  %v1289_v49 = vpop.permute.xlu2 %1288 }
 0x3b8   : > { %v1323_v58 = vadd.f32 %v1283_v63, %v2964_v4  ;;  %v767_v4 = vsel %vm739_vm1, %v3104_v8, -inf  ;;  %v1326_v10 = vadd.f32 %v1289_v49, %v2977_v13 }
 0x3b9   : > { %v1401_v42 = vpop.permute.xlu1 %1400 }
 0x3ba   : > { %v1346_v61 = vadd.f32 %v3334_v31, %v1323_v58  ;;  %2497 = vmatmul.msk.bf16.vlgmr.msra.gmra.mxu3 %vm495_vm0, %v1401_v42  ;;  %v1349_v30 = vadd.f32 %v3334_v31, %v1326_v10 }
 0x3bc   : > { %v1363_v40 = vmax.f32 %v1346_v61, 0.0  ;;  %v1241_v46 = vpop.f32.mrf.mxu2  ;;  %v1366_v43 = vmax.f32 %v1349_v30, 0.0  ;;  %v785_v61 = vsel %vm739_vm1, %v3177_v14, -inf }
 0x3bd   : > { %1294 = vrot.lane.b32.xlu0 %v1241_v46, %s2784_s21 }
 0x3be   : > { %v1375_v47 = vpack.c.bf16 %v1364_v21, %v1363_v40 }
 0x3c0   : > { %1410 = vrot.lane.b32.xlu1 %v1375_v47, %s2784_s21 }
 0x3c4   : > { %v1243_v0 = vpop.f32.mrf.mxu2 }
 0x3c7   : > { %759 = vmax.xlane.f32.xlu2 %v758_v6  ;;  %v1287_v62 = vpop.permute.xlu0 %1286 }
 0x3c8   : > { %v1325_v60 = vadd.f32 %v1287_v62, %v2973_v11  ;;  %v755_v11 = vsel %vm739_vm1, %v3051_v2, -inf }
 0x3ca   : > { %v1348_v55 = vadd.f32 %v3334_v31, %v1325_v60 }
 0x3cc   : > { %v1365_v54 = vmax.f32 %v1348_v55, 0.0  ;;  %v3448_v55 = vld [vmem:[%s4341_s10] ss:$0 sm:$0xff] }
 0x3ce   : > { %v1376_v56 = vpack.c.bf16 %v1366_v43, %v1365_v54 }
 0x3cf   : > { %768 = vmax.xlane.f32.xlu2 %v767_v4 }
 0x3d7   : > { %777 = vmax.xlane.f32.xlu2 %v776_v17  ;;  %v1291_v29 = vpop.permute.xlu0 %1290  ;;  %v788_v17 = vsel %vm739_vm1, %v3214_v7, -inf }
 0x3d8   : > { %v1327_v41 = vadd.f32 %v1291_v29, %v2984_v20  ;;  %v782_v20 = vsel %vm739_vm1, %v3156_v35, -inf }
 0x3da   : > { %v1350_v5 = vadd.f32 %v3334_v31, %v1327_v41 }
 0x3dc   : > { %v1367_v39 = vmax.f32 %v1350_v5, 0.0  ;;  %v792_v5 = vsub.f32 %v3014_v37, %v3377_v32 }
 0x3e4   : > { %v3413_v13 = vpop.xlane.xlu1 %771 }
 0x3e7   : > { %750 = vmax.xlane.f32.xlu0 %v749_v26 }
 0x3ea   : > { %780 = vmax.xlane.f32.xlu1 %v779_v51 }
 0x3ef   : > { %1412 = vrot.lane.b32.xlu2 %v1376_v56, %s2784_s21  ;;  %756 = vmax.xlane.f32.xlu0 %v755_v11 }
 0x3f7   : > { %765 = vmax.xlane.f32.xlu0 %v764_v25 }
 0x3f9   : > { %v748_v28 = vpop.xlane.xlu2 %747 }
 0x3fa   : > { %v793_v40 = vsub.f32 %v3024_v45, %v748_v28 }
 0x3fc   : > { %v1403_v19 = vpop.permute.xlu1 %1402  ;;  %v812_v47 = vmul.f32 1.442695, %v793_v40 }
 0x3fd   : > { %2498 = vmatmul.msk.bf16.gmra.mxu3 %vm495_vm0, %v1403_v19 }
 0x3ff   : > { %774 = vmax.xlane.f32.xlu0 %v773_v53 }
 0x401   : > { %v1293_v33 = vpop.permute.xlu2 %1292 }
 0x402   : > { %v1328_v57 = vadd.f32 %v1293_v33, %v3006_v27  ;;  %v742_v34 = vpop.xlane.xlu0 %741 }
 0x403   : > { %v791_v12 = vsub.f32 %v2999_v24, %v742_v34 }
 0x404   : > { %v1351_v15 = vadd.f32 %v3334_v31, %v1328_v57  ;;  %v1405_v58 = vpop.permute.xlu1 %1404  ;;  %v810_v57 = vmul.f32 1.442695, %v792_v5 }
 0x405   : > { %v808_v38 = vmul.f32 1.442695, %v791_v12 }
 0x406   : > { %v1368_v63 = vmax.f32 %v1351_v15, 0.0 }
 0x407   : > { %2605 = vpow2.f32 %v808_v38  ;;  %783 = vmax.xlane.f32.xlu0 %v782_v20 }
 0x408   : > { %v1377_v3 = vpack.c.bf16 %v1368_v63, %v1367_v39  ;;  %2607 = vpow2.f32 %v812_v47  ;;  %v795_v39 = vsub.f32 %v3042_v59, %v3381_v44 }
 0x40a   : > { %1414 = vrot.lane.b32.xlu1 %v1377_v3, %s2784_s21  ;;  %v816_v3 = vmul.f32 1.442695, %v795_v39 }
 0x40c   : > { %v1407_v21 = vpop.permute.xlu1 %1406 }
 0x40d   : > { %v3428_v42 = vpop.eup %2605  ;;  %2499 = vmatmul.msk.bf16.gmra.mxu3 %vm495_vm0, %v1405_v58 }
 0x40e   : > { %v842_v27 = vsel %vm739_vm1, %v3428_v42, 0.0  ;;  %v3442_v60 = vpop.eup %2607 }
 0x40f   : > { %843 = vadd.xlane.f32.xlu0 %v842_v27 }
 0x418   : > { %786 = vmax.xlane.f32.xlu2 %v785_v61 }
 0x41d   : > { %2500 = vmatmul.msk.bf16.gmra.mxu3 %vm495_vm0, %v1407_v21 }
 0x422   : > { %v1409_v46 = vpop.permute.xlu1 %1408 }
 0x42d   : > { %2501 = vmatmul.msk.bf16.gmra.mxu3 %vm495_vm0, %v1409_v46  ;;  %v798_v46 = vsub.f32 %v3069_v16, %v3387_v18 }
 0x42f   : > { %v1295_v0 = vpop.permute.xlu0 %1294 }
 0x430   : > { %v1329_v6 = vadd.f32 %v1295_v0, %v3085_v36  ;;  %v848_v36 = vsel %vm739_vm1, %v3442_v60, 0.0 }
 0x432   : > { %v1352_v4 = vadd.f32 %v3334_v31, %v1329_v6  ;;  %v1411_v31 = vpop.permute.xlu1 %1410 }
 0x434   : > { %v1369_v62 = vmax.f32 %v1352_v4, 0.0  ;;  %789 = vmax.xlane.f32.xlu1 %v788_v17 }
 0x436   : > { %v1378_v49 = vpack.c.bf16 %v1369_v62, %v1369_v62  ;;  %v822_v62 = vmul.f32 1.442695, %v798_v46 }
 0x438   : > { %1416 = vrot.lane.b32.xlu2 %v1378_v49, %s2784_s21 }
 0x43a   : > { %v760_v10 = vpop.xlane.xlu2 %759 }
 0x43b   : > { %v797_v44 = vsub.f32 %v3060_v9, %v760_v10 }
 0x43c   : > { %849 = vadd.xlane.f32.xlu1 %v848_v36 }
 0x43d   : > { %v1478_v26 = vpop.f32.mrf.mxu3  ;;  %2502 = vmatmul.msk.bf16.gmra.mxu3 %vm495_vm0, %v1411_v31  ;;  %v820_v17 = vmul.f32 1.442695, %v797_v44 }
 0x43e   : > { %v3454_v30 = vadd.f32 %v3448_v55, %v1478_v26 }
 0x440   : > { %v1539_v54 = vand.u32 2147483647, %v3454_v30  ;;  %2016 = vst.msk [vmem:[%s3205_s18] sm:$0xff] %vm2015_vm2, %v3454_v30  ;;  %v1522_v63 = vmax.f32 %v3454_v30, 0.0 }
 0x442   : > { %v1556_v51 = vsub.f32 0.0, %v1539_v54  ;;  %v769_v43 = vpop.xlane.xlu2 %768  ;;  %v801_v54 = vsub.f32 %v3116_v22, %v3413_v13 }
 0x443   : > { %v800_v31 = vsub.f32 %v3104_v8, %v769_v43 }
 0x444   : > { %v1573_v56 = vmul.f32 1.442695, %v1556_v51 }
 0x445   : > { %v1480_v11 = vpop.f32.mrf.mxu3 }
 0x446   : > { %2609 = vpow2.f32 %v1573_v56  ;;  %v3461_v25 = vadd.f32 %v3448_v55, %v1480_v11  ;;  %v826_v11 = vmul.f32 1.442695, %v800_v31 }
 0x448   : > { %v1540_v28 = vand.u32 2147483647, %v3461_v25  ;;  %2017 = vst.msk [vmem:[%s3205_s18 + $0x10] sm:$0xff] %vm2015_vm2, %v3461_v25  ;;  %v1523_v47 = vmax.f32 %v3461_v25, 0.0 }
 0x44a   : > { %v1557_v29 = vsub.f32 0.0, %v1540_v28  ;;  %v3467_v19 = vpop.xlane.xlu2 %777  ;;  %v828_v28 = vmul.f32 1.442695, %v801_v54 }
 0x44b   : > { %v803_v5 = vsub.f32 %v3144_v1, %v3467_v19 }
 0x44c   : > { %v2610_v41 = vpop.eup %2609  ;;  %v1575_v53 = vmul.f32 1.442695, %v1557_v29 }
 0x44d   : > { %v1607_v33 = vadd.f32 1.0, %v2610_v41  ;;  %v832_v39 = vmul.f32 1.442695, %v803_v5 }
 0x44e   : > { %2611 = vpow2.f32 %v1575_v53 }
 0x44f   : > { %2613 = vlog2.f32 %v1607_v33 }
 0x450   : > { %2615 = vpow2.f32 %v810_v57 }
 0x452   : > { %v1413_v34 = vpop.permute.xlu2 %1412 }
 0x453   : > { %2503 = vmatmul.msk.bf16.gmra.mxu3 %vm495_vm0, %v1413_v34 }
 0x454   : > { %v2612_v12 = vpop.eup %2611 }
 0x455   : > { %v2614_v15 = vpop.eup %2613  ;;  %v1608_v38 = vadd.f32 1.0, %v2612_v12 }
 0x456   : > { %v1625_v20 = vmul.f32 0.6931472, %v2614_v15  ;;  %v3481_v61 = vpop.eup %2615 }
 0x457   : > { %2617 = vlog2.f32 %v1608_v38  ;;  %v845_v4 = vsel %vm739_vm1, %v3481_v61, 0.0 }
 0x458   : > { %v3475_v32 = vadd.f32 %v1625_v20, %v1522_v63  ;;  %2619 = vpow2.f32 %v816_v3 }
 0x45a   : > { %v751_v58 = vpop.xlane.xlu0 %750  ;;  %2034 = vst.msk [vmem:[%s3205_s18] sm:$0xff] %vm2033_vm3, %v3475_v32 }
 0x45b   : > { %v794_v27 = vsub.f32 %v3033_v52, %v751_v58 }
 0x45d   : > { %v2618_v21 = vpop.eup %2617  ;;  %v814_v40 = vmul.f32 1.442695, %v794_v27  ;;  %v781_v43 = vpop.xlane.xlu1 %780 }
 0x45e   : > { %v1627_v0 = vmul.f32 0.6931472, %v2618_v21  ;;  %v3495_v36 = vpop.eup %2619  ;;  %v804_v34 = vsub.f32 %v3091_v48, %v781_v43 }
 0x45f   : > { %2621 = vpow2.f32 %v814_v40  ;;  %v854_v56 = vsel %vm739_vm1, %v3495_v36, 0.0 }
 0x460   : > { %v3487_v6 = vadd.f32 %v1627_v0, %v1523_v47  ;;  %2623 = vpow2.f32 %v820_v17  ;;  %v834_v63 = vmul.f32 1.442695, %v804_v34 }
 0x461   : > { %846 = vadd.xlane.f32.xlu2 %v845_v4  ;;  %2625 = vpow2.f32 %v822_v62 }
 0x462   : > { %v757_v49 = vpop.xlane.xlu0 %756  ;;  %2035 = vst.msk [vmem:[%s3205_s18 + $0x10] sm:$0xff] %vm2033_vm3, %v3487_v6 }
 0x463   : > { %v796_v10 = vsub.f32 %v3051_v2, %v757_v49 }
 0x465   : > { %v3497_v18 = vpop.eup %2621  ;;  %v818_v26 = vmul.f32 1.442695, %v796_v10 }
 0x466   : > { %v851_v51 = vsel %vm739_vm1, %v3497_v18, 0.0  ;;  %v3506_v41 = vpop.eup %2623 }
 0x467   : > { %2627 = vpow2.f32 %v818_v26  ;;  %852 = vadd.xlane.f32.xlu0 %v851_v51  ;;  %v3509_v33 = vpop.eup %2625  ;;  %v860_v12 = vsel %vm739_vm1, %v3506_v41, 0.0 }
 0x468   : > { %2629 = vpow2.f32 %v826_v11  ;;  %v863_v38 = vsel %vm739_vm1, %v3509_v33, 0.0 }
 0x469   : > { %855 = vadd.xlane.f32.xlu2 %v854_v56  ;;  %2631 = vpow2.f32 %v828_v28 }
 0x46a   : > { %v766_v29 = vpop.xlane.xlu0 %765 }
 0x46b   : > { %v799_v53 = vsub.f32 %v3078_v23, %v766_v29 }
 0x46d   : > { %v3511_v13 = vpop.eup %2627  ;;  %v824_v57 = vmul.f32 1.442695, %v799_v53 }
 0x46e   : > { %v857_v15 = vsel %vm739_vm1, %v3511_v13, 0.0  ;;  %v3522_v20 = vpop.eup %2629 }
 0x46f   : > { %2633 = vpow2.f32 %v824_v57  ;;  %861 = vadd.xlane.f32.xlu0 %v860_v12  ;;  %858 = vadd.xlane.f32.xlu1 %v857_v15  ;;  %v3525_v58 = vpop.eup %2631  ;;  %v869_v44 = vsel %vm739_vm1, %v3522_v20, 0.0 }
 0x470   : > { %2635 = vpow2.f32 %v832_v39  ;;  %v872_v46 = vsel %vm739_vm1, %v3525_v58, 0.0 }
 0x471   : > { %864 = vadd.xlane.f32.xlu2 %v863_v38  ;;  %2637 = vpow2.f32 %v834_v63 }
 0x472   : > { %v775_v19 = vpop.xlane.xlu0 %774 }
 0x473   : > { %v802_v3 = vsub.f32 %v3130_v50, %v775_v19 }
 0x475   : > { %v3527_v27 = vpop.eup %2633  ;;  %v830_v21 = vmul.f32 1.442695, %v802_v3 }
 0x476   : > { %v866_v40 = vsel %vm739_vm1, %v3527_v27, 0.0  ;;  %v3535_v0 = vpop.eup %2635 }
 0x477   : > { %2639 = vpow2.f32 %v830_v21  ;;  %870 = vadd.xlane.f32.xlu0 %v869_v44  ;;  %867 = vadd.xlane.f32.xlu1 %v866_v40  ;;  %v3538_v17 = vpop.eup %2637  ;;  %v878_v31 = vsel %vm739_vm1, %v3535_v0, 0.0 }
 0x478   : > { %v881_v51 = vsel %vm739_vm1, %v3538_v17, 0.0 }
 0x479   : > { %873 = vadd.xlane.f32.xlu2 %v872_v46 }
 0x47a   : > { %v784_v47 = vpop.xlane.xlu0 %783 }
 0x47b   : > { %v805_v4 = vsub.f32 %v3156_v35, %v784_v47 }
 0x47c   : > { %v1415_v62 = vpop.permute.xlu1 %1414 }
 0x47d   : > { %v3540_v49 = vpop.eup %2639  ;;  %v836_v10 = vmul.f32 1.442695, %v805_v4  ;;  %2504 = vmatmul.msk.bf16.gmra.mxu3 %vm495_vm0, %v1415_v62 }
 0x47e   : > { %v875_v26 = vsel %vm739_vm1, %v3540_v49, 0.0 }
 0x47f   : > { %2641 = vpow2.f32 %v836_v10  ;;  %879 = vadd.xlane.f32.xlu0 %v878_v31  ;;  %876 = vadd.xlane.f32.xlu1 %v875_v26 }
 0x480   : > { %v1483_v54 = vpop.f32.mrf.mxu3 }
 0x481   : > { %v3550_v56 = vadd.f32 %v3448_v55, %v1483_v54  ;;  %882 = vadd.xlane.f32.xlu2 %v881_v51 }
 0x483   : > { %v1541_v11 = vand.u32 2147483647, %v3550_v56  ;;  %2018 = vst.msk [vmem:[%s3205_s18 + $0x20] sm:$0xff] %vm2015_vm2, %v3550_v56 }
 0x485   : > { %v3556_v28 = vpop.eup %2641  ;;  %v1558_v29 = vsub.f32 0.0, %v1541_v11  ;;  %v1524_v11 = vmax.f32 %v3550_v56, 0.0 }
 0x486   : > { %v884_v43 = vsel %vm739_vm1, %v3556_v28, 0.0 }
 0x487   : > { %v1577_v53 = vmul.f32 1.442695, %v1558_v29  ;;  %885 = vadd.xlane.f32.xlu1 %v884_v43 }
 0x488   : > { %v1485_v5 = vpop.f32.mrf.mxu3 }
 0x489   : > { %2643 = vpow2.f32 %v1577_v53  ;;  %v3561_v57 = vadd.f32 %v3448_v55, %v1485_v5 }
 0x48b   : > { %v1542_v34 = vand.u32 2147483647, %v3561_v57  ;;  %2019 = vst.msk [vmem:[%s3205_s18 + $0x30] sm:$0xff] %vm2015_vm2, %v3561_v57  ;;  %v787_v12 = vpop.xlane.xlu2 %786 }
 0x48c   : > { %v806_v15 = vsub.f32 %v3177_v14, %v787_v12 }
 0x48d   : > { %v1559_v38 = vsub.f32 0.0, %v1542_v34 }
 0x48e   : > { %v838_v39 = vmul.f32 1.442695, %v806_v15 }
 0x48f   : > { %v2644_v63 = vpop.eup %2643  ;;  %v1579_v19 = vmul.f32 1.442695, %v1559_v38 }
 0x490   : > { %v1609_v3 = vadd.f32 1.0, %v2644_v63  ;;  %2645 = vpow2.f32 %v838_v39  ;;  %v1488_v21 = vpop.f32.mrf.mxu3 }
 0x491   : > { %2647 = vpow2.f32 %v1579_v19  ;;  %v3569_v44 = vadd.f32 %v3448_v55, %v1488_v21  ;;  %v1525_v19 = vmax.f32 %v3561_v57, 0.0 }
 0x492   : > { %2649 = vlog2.f32 %v1609_v3 }
 0x493   : > { %v1543_v40 = vand.u32 2147483647, %v3569_v44  ;;  %2020 = vst.msk [vmem:[%s3205_s18 + $0x40] sm:$0xff] %vm2015_vm2, %v3569_v44  ;;  %v1417_v46 = vpop.permute.xlu2 %1416 }
 0x494   : > { %2505 = vmatmul.msk.bf16.gmra.mxu3 %vm495_vm0, %v1417_v46 }
 0x495   : > { %v1560_v47 = vsub.f32 0.0, %v1543_v40 }
 0x496   : > { %v3576_v4 = vpop.eup %2645 }
 0x497   : > { %v2648_v62 = vpop.eup %2647  ;;  %v1581_v10 = vmul.f32 1.442695, %v1560_v47  ;;  %v887_v31 = vsel %vm739_vm1, %v3576_v4, 0.0 }
 0x498   : > { %v2650_v26 = vpop.eup %2649  ;;  %v1610_v54 = vadd.f32 1.0, %v2648_v62  ;;  %888 = vadd.xlane.f32.xlu0 %v887_v31  ;;  %v1490_v51 = vpop.f32.mrf.mxu3 }
 0x499   : > { %v1629_v29 = vmul.f32 0.6931472, %v2650_v26  ;;  %2651 = vpow2.f32 %v1581_v10  ;;  %v3582_v43 = vadd.f32 %v3448_v55, %v1490_v51 }
 0x49a   : > { %2653 = vlog2.f32 %v1610_v54 }
 0x49b   : > { %v3584_v53 = vadd.f32 %v1629_v29, %v1524_v11  ;;  %v1544_v5 = vand.u32 2147483647, %v3582_v43  ;;  %2021 = vst.msk [vmem:[%s3205_s18 + $0x50] sm:$0xff] %vm2015_vm2, %v3582_v43  ;;  %v1526_v11 = vmax.f32 %v3569_v44, 0.0 }
 0x49d   : > { %v1561_v34 = vsub.f32 0.0, %v1544_v5  ;;  %2036 = vst.msk [vmem:[%s3205_s18 + $0x20] sm:$0xff] %vm2033_vm3, %v3584_v53 }
 0x49f   : > { %v2652_v12 = vpop.eup %2651  ;;  %v1583_v15 = vmul.f32 1.442695, %v1561_v34 }
 0x4a0   : > { %v2654_v38 = vpop.eup %2653  ;;  %v1611_v39 = vadd.f32 1.0, %v2652_v12  ;;  %v1493_v63 = vpop.f32.mrf.mxu3  ;;  %2154 = vrot.lane.b32.xlu1 %v2999_v24, %s2785_s14 }
 0x4a1   : > { %v1631_v3 = vmul.f32 0.6931472, %v2654_v38  ;;  %2655 = vpow2.f32 %v1583_v15  ;;  %v3597_v21 = vadd.f32 %v3448_v55, %v1493_v63 }
 0x4a2   : > { %2657 = vlog2.f32 %v1611_v39 }
 0x4a3   : > { %v3599_v40 = vadd.f32 %v1631_v3, %v1525_v19  ;;  %v1545_v46 = vand.u32 2147483647, %v3597_v21  ;;  %2022 = vst.msk [vmem:[%s3205_s18 + $0x60] sm:$0xff] %vm2015_vm2, %v3597_v21 }
 0x4a5   : > { %v1562_v47 = vsub.f32 0.0, %v1545_v46  ;;  %2037 = vst.msk [vmem:[%s3205_s18 + $0x30] sm:$0xff] %vm2033_vm3, %v3599_v40  ;;  %v1527_v46 = vmax.f32 %v3582_v43, 0.0 }
 0x4a7   : > { %v2656_v24 = vpop.eup %2655  ;;  %v1585_v62 = vmul.f32 1.442695, %v1562_v47  ;;  %v790_v10 = vpop.xlane.xlu1 %789 }
 0x4a8   : > { %v2658_v31 = vpop.eup %2657  ;;  %v1612_v26 = vadd.f32 1.0, %v2656_v24  ;;  %v807_v54 = vsub.f32 %v3214_v7, %v790_v10  ;;  %v1495_v51 = vpop.f32.mrf.mxu3  ;;  %2160 = vrot.lane.b32.xlu1 %v3033_v52, %s2785_s14 }
 0x4a9   : > { %v1633_v29 = vmul.f32 0.6931472, %v2658_v31  ;;  %2659 = vpow2.f32 %v1585_v62  ;;  %v3613_v5 = vadd.f32 %v3448_v55, %v1495_v51 }
 0x4aa   : > { %2661 = vlog2.f32 %v1612_v26  ;;  %v840_v34 = vmul.f32 1.442695, %v807_v54 }
 0x4ab   : > { %v3615_v12 = vadd.f32 %v1633_v29, %v1526_v11  ;;  %v1546_v15 = vand.u32 2147483647, %v3613_v5  ;;  %2023 = vst.msk [vmem:[%s3205_s18 + $0x70] sm:$0xff] %vm2015_vm2, %v3613_v5 }
 0x4ac   : > { %2663 = vpow2.f32 %v840_v34  ;;  %2158 = vrot.lane.b32.xlu0 %v3024_v45, %s2785_s14  ;;  %v1528_v34 = vmax.f32 %v3597_v21, 0.0 }
 0x4ad   : > { %v1563_v52 = vsub.f32 0.0, %v1546_v15  ;;  %2038 = vst.msk [vmem:[%s3205_s18 + $0x40] sm:$0xff] %vm2033_vm3, %v3615_v12 }
 0x4af   : > { %v2660_v38 = vpop.eup %2659  ;;  %v1587_v39 = vmul.f32 1.442695, %v1563_v52 }
 0x4b0   : > { %v2662_v63 = vpop.eup %2661  ;;  %v1613_v19 = vadd.f32 1.0, %v2660_v38  ;;  %v1498_v3 = vpop.f32.mrf.mxu3  ;;  %2166 = vrot.lane.b32.xlu1 %v3060_v9, %s2785_s14 }
 0x4b1   : > { %v1635_v47 = vmul.f32 0.6931472, %v2662_v63  ;;  %2665 = vpow2.f32 %v1587_v39  ;;  %v3630_v45 = vadd.f32 %v3448_v55, %v1498_v3 }
 0x4b2   : > { %v3632_v24 = vpop.eup %2663  ;;  %2667 = vlog2.f32 %v1613_v19 }
 0x4b3   : > { %v3634_v62 = vadd.f32 %v1635_v47, %v1527_v46  ;;  %v1547_v10 = vand.u32 2147483647, %v3630_v45  ;;  %2024 = vst.msk [vmem:[%s3205_s18 + $0x80] sm:$0xff] %vm2015_vm2, %v3630_v45  ;;  %v890_v9 = vsel %vm739_vm1, %v3632_v24, 0.0  ;;  %v1529_v47 = vmax.f32 %v3613_v5, 0.0 }
 0x4b4   : > { %2164 = vrot.lane.b32.xlu0 %v3051_v2, %s2785_s14  ;;  %891 = vadd.xlane.f32.xlu2 %v890_v9 }
 0x4b5   : > { %v1564_v31 = vsub.f32 0.0, %v1547_v10  ;;  %2039 = vst.msk [vmem:[%s3205_s18 + $0x50] sm:$0xff] %vm2033_vm3, %v3634_v62 }
 0x4b7   : > { %v2666_v26 = vpop.eup %2665  ;;  %v1589_v54 = vmul.f32 1.442695, %v1564_v31 }
 0x4b8   : > { %v2668_v51 = vpop.eup %2667  ;;  %v1614_v11 = vadd.f32 1.0, %v2666_v26  ;;  %v1500_v29 = vpop.f32.mrf.mxu3  ;;  %2172 = vrot.lane.b32.xlu1 %v3104_v8, %s2785_s14 }
 0x4b9   : > { %v1637_v15 = vmul.f32 0.6931472, %v2668_v51  ;;  %2669 = vpow2.f32 %v1589_v54  ;;  %v3651_v2 = vadd.f32 %v3448_v55, %v1500_v29  ;;  %v844_v26 = vpop.xlane.xlu0 %843 }
 0x4ba   : > { %2671 = vlog2.f32 %v1614_v11 }
 0x4bb   : > { %v3653_v52 = vadd.f32 %v1637_v15, %v1528_v34  ;;  %v1548_v38 = vand.u32 2147483647, %v3651_v2  ;;  %2025 = vst.msk [vmem:[%s3205_s18 + $0x90] sm:$0xff] %vm2015_vm2, %v3651_v2  ;;  %v1530_v15 = vmax.f32 %v3630_v45, 0.0 }
 0x4bc   : > { %2170 = vrot.lane.b32.xlu0 %v3078_v23, %s2785_s14 }
 0x4bd   : > { %v1565_v8 = vsub.f32 0.0, %v1548_v38  ;;  %2040 = vst.msk [vmem:[%s3205_s18 + $0x60] sm:$0xff] %vm2033_vm3, %v3653_v52 }
 0x4bf   : > { %v2670_v39 = vpop.eup %2669  ;;  %v1591_v63 = vmul.f32 1.442695, %v1565_v8 }
 0x4c0   : > { %v2672_v19 = vpop.eup %2671  ;;  %v1615_v3 = vadd.f32 1.0, %v2670_v39  ;;  %v1503_v46 = vpop.f32.mrf.mxu3  ;;  %2178 = vrot.lane.b32.xlu1 %v3144_v1, %s2785_s14 }
 0x4c1   : > { %v1639_v10 = vmul.f32 0.6931472, %v2672_v19  ;;  %2673 = vpow2.f32 %v1591_v63  ;;  %v3668_v23 = vadd.f32 %v3448_v55, %v1503_v46 }
 0x4c2   : > { %2675 = vlog2.f32 %v1615_v3 }
 0x4c3   : > { %v3670_v9 = vadd.f32 %v1639_v10, %v1529_v47  ;;  %v1549_v31 = vand.u32 2147483647, %v3668_v23  ;;  %2026 = vst.msk [vmem:[%s3205_s18 + $0xa0] sm:$0xff] %vm2015_vm2, %v3668_v23  ;;  %2677 = vrcp.f32 %v844_v26  ;;  %v1531_v10 = vmax.f32 %v3651_v2, 0.0 }
 0x4c4   : > { %2176 = vrot.lane.b32.xlu0 %v3130_v50, %s2785_s14 }
 0x4c5   : > { %v1566_v1 = vsub.f32 0.0, %v1549_v31  ;;  %2041 = vst.msk [vmem:[%s3205_s18 + $0x70] sm:$0xff] %vm2033_vm3, %v3670_v9 }
 0x4c7   : > { %v2674_v54 = vpop.eup %2673  ;;  %v1593_v51 = vmul.f32 1.442695, %v1566_v1 }
 0x4c8   : > { %v2676_v11 = vpop.eup %2675  ;;  %v1616_v29 = vadd.f32 1.0, %v2674_v54  ;;  %v1505_v34 = vpop.f32.mrf.mxu3  ;;  %2184 = vrot.lane.b32.xlu1 %v3177_v14, %s2785_s14 }
 0x4c9   : > { %v1641_v38 = vmul.f32 0.6931472, %v2676_v11  ;;  %2679 = vpow2.f32 %v1593_v51  ;;  %v3685_v50 = vadd.f32 %v3448_v55, %v1505_v34  ;;  %v2678_v63 = vpop.eup %2677  ;;  %v3714_v11 = vadd.f32 1e-10, %v3487_v6 }
 0x4ca   : > { %2681 = vlog2.f32 %v1616_v29  ;;  %v1532_v34 = vmax.f32 %v3668_v23, 0.0 }
 0x4cb   : > { %v3687_v8 = vadd.f32 %v1641_v38, %v1530_v15  ;;  %v1550_v39 = vand.u32 2147483647, %v3685_v50  ;;  %2027 = vst.msk [vmem:[%s3205_s18 + $0xb0] sm:$0xff] %vm2015_vm2, %v3685_v50  ;;  %v3722_v38 = vadd.f32 1e-10, %v3475_v32  ;;  %vm1728_vm5 = vcmp.eq.f32.partialorder %v3714_v11, inf }
 0x4cc   : > { %2182 = vrot.lane.b32.xlu0 %v3156_v35, %s2785_s14  ;;  %2156 = vrot.lane.b32.xlu2 %v3014_v37, %s2785_s14  ;;  %v910_v35 = vmul.f32 %v2678_v63, %v3428_v42  ;;  %vm1730_vm7 = vcmp.eq.f32.partialorder %v3714_v11, 0.0 }
 0x4cd   : > { %v1567_v14 = vsub.f32 0.0, %v1550_v39  ;;  %2042 = vst.msk [vmem:[%s3205_s18 + $0x80] sm:$0xff] %vm2033_vm3, %v3687_v8  ;;  %vm1716_vm4 = vcmp.eq.f32.partialorder %v3722_v38, inf  ;;  %vm1718_vm6 = vcmp.eq.f32.partialorder %v3722_v38, 0.0 }
 0x4cf   : > { %v2680_v19 = vpop.eup %2679  ;;  %v1595_v3 = vmul.f32 1.442695, %v1567_v14 }
 0x4d0   : > { %v2682_v46 = vpop.eup %2681  ;;  %v1617_v47 = vadd.f32 1.0, %v2680_v19 }
 0x4d1   : > { %v1643_v31 = vmul.f32 0.6931472, %v2682_v46  ;;  %2683 = vpow2.f32 %v1595_v3 }
 0x4d2   : > { %2685 = vlog2.f32 %v1617_v47 }
 0x4d3   : > { %v3702_v26 = vadd.f32 %v1643_v31, %v1531_v10  ;;  %v1533_v31 = vmax.f32 %v3685_v50, 0.0 }
 0x4d4   : > { %2240 = vrot.lane.b32.xlu0 %v910_v35, %s2786_s15  ;;  %v847_v37 = vpop.xlane.xlu2 %846  ;;  %2162 = vrot.lane.b32.xlu2 %v3042_v59, %s2785_s14 }
 0x4d5   : > { %2687 = vrcp.f32 %v847_v37  ;;  %2043 = vst.msk [vmem:[%s3205_s18 + $0x90] sm:$0xff] %vm2033_vm3, %v3702_v26 }
 0x4d6   : > { %v1508_v1 = vpop.f32.mrf.mxu3 }
 0x4d7   : > { %v2684_v54 = vpop.eup %2683  ;;  %v3711_v51 = vadd.f32 %v3448_v55, %v1508_v1 }
 0x4d8   : > { %v2686_v42 = vpop.eup %2685  ;;  %v1618_v29 = vadd.f32 1.0, %v2684_v54  ;;  %v3749_v54 = vadd.f32 1e-10, %v3615_v12 }
 0x4d9   : > { %v1645_v15 = vmul.f32 0.6931472, %v2686_v42  ;;  %v1551_v59 = vand.u32 2147483647, %v3711_v51  ;;  %2028 = vst.msk [vmem:[%s3205_s18 + $0xc0] sm:$0xff] %vm2015_vm2, %v3711_v51 }
 0x4da   : > { %2689 = vlog2.f32 %v1618_v29  ;;  %v853_v39 = vpop.xlane.xlu0 %852  ;;  %vm1764_vm10 = vcmp.eq.f32.partialorder %v3749_v54, inf  ;;  %vm1766_vm12 = vcmp.eq.f32.partialorder %v3749_v54, 0.0 }
 0x4db   : > { %v2688_v14 = vpop.eup %2687  ;;  %v3724_v63 = vadd.f32 %v1645_v15, %v1532_v34  ;;  %v1568_v6 = vsub.f32 0.0, %v1551_v59  ;;  %2691 = vrcp.f32 %v853_v39 }
 0x4dc   : > { %v856_v19 = vpop.xlane.xlu2 %855  ;;  %2168 = vrot.lane.b32.xlu2 %v3069_v16, %s2785_s14  ;;  %v911_v3 = vmul.f32 %v2688_v14, %v3481_v61  ;;  %2693 = vrsqrt.f32 %v3714_v11  ;;  %v3739_v61 = vadd.f32 1e-10, %v3599_v40 }
 0x4dd   : > { %v1597_v46 = vmul.f32 1.442695, %v1568_v6  ;;  %2695 = vrcp.f32 %v856_v19  ;;  %2044 = vst.msk [vmem:[%s3205_s18 + $0xa0] sm:$0xff] %vm2033_vm3, %v3724_v63 }
 0x4de   : > { %v1510_v32 = vpop.f32.mrf.mxu3  ;;  %2242 = vrot.lane.b32.xlu1 %v911_v3, %s2786_s15  ;;  %2697 = vrsqrt.f32 %v3722_v38  ;;  %vm1752_vm8 = vcmp.eq.f32.partialorder %v3739_v61, inf  ;;  %vm1754_vm9 = vcmp.eq.f32.partialorder %v3739_v61, 0.0 }
 0x4df   : > { %2699 = vpow2.f32 %v1597_v46  ;;  %v3736_v47 = vadd.f32 %v3448_v55, %v1510_v32 }
 0x4e0   : > { %v2690_v16 = vpop.eup %2689 }
 0x4e1   : > { %v2692_v10 = vpop.eup %2691  ;;  %v1647_v35 = vmul.f32 0.6931472, %v2690_v16  ;;  %v1552_v37 = vand.u32 2147483647, %v3736_v47  ;;  %2029 = vst.msk [vmem:[%s3205_s18 + $0xd0] sm:$0xff] %vm2015_vm2, %v3736_v47 }
 0x4e2   : > { %v3746_v1 = vpop.eup %2693  ;;  %v862_v42 = vpop.xlane.xlu0 %861  ;;  %v913_v29 = vmul.f32 %v2692_v10, %v3497_v18  ;;  %v3776_v16 = vadd.f32 1e-10, %v3653_v52 }
 0x4e3   : > { %v2696_v40 = vpop.eup %2695  ;;  %v3752_v34 = vadd.f32 %v1647_v35, %v1533_v31  ;;  %v1569_v15 = vsub.f32 0.0, %v1552_v37  ;;  %2701 = vrcp.f32 %v862_v42  ;;  %v1722_v19 = vmul.f32 %v3746_v1, %v3714_v11 }
 0x4e4   : > { %v3754_v59 = vpop.eup %2697  ;;  %2246 = vrot.lane.b32.xlu0 %v913_v29, %s2786_s15  ;;  %v865_v39 = vpop.xlane.xlu2 %864  ;;  %2174 = vrot.lane.b32.xlu2 %v3116_v22, %s2785_s14  ;;  %v914_v12 = vmul.f32 %v2696_v40, %v3495_v36  ;;  %2703 = vrsqrt.f32 %v3739_v61  ;;  %v3769_v22 = vadd.f32 1e-10, %v3584_v53  ;;  %v3781_v53 = vadd.f32 1e-10, %v3670_v9 }
 0x4e5   : > { %v2700_v14 = vpop.eup %2699  ;;  %v1599_v6 = vmul.f32 1.442695, %v1569_v15  ;;  %2705 = vrcp.f32 %v865_v39  ;;  %2045 = vst.msk [vmem:[%s3205_s18 + $0xb0] sm:$0xff] %vm2033_vm3, %v3752_v34  ;;  %v850_v36 = vpop.xlane.xlu1 %849  ;;  %v1710_v3 = vmul.f32 %v3754_v59, %v3722_v38  ;;  %v1723_v35 = vmul.f32 %v3746_v1, %v1722_v19 }
 0x4e6   : > { %v1619_v18 = vadd.f32 1.0, %v2700_v14  ;;  %2248 = vrot.lane.b32.xlu1 %v914_v12, %s2786_s15  ;;  %2707 = vrsqrt.f32 %v3749_v54  ;;  %vm1740_vm11 = vcmp.eq.f32.partialorder %v3769_v22, inf  ;;  %vm1788_vm13 = vcmp.eq.f32.partialorder %v3776_v16, inf }
 0x4e7   : > { %2709 = vpow2.f32 %v1599_v6  ;;  %v1711_v40 = vmul.f32 %v3754_v59, %v1710_v3  ;;  %v1724_v39 = vmul.f32 0.5, %v1723_v35  ;;  %vm1790_vm14 = vcmp.eq.f32.partialorder %v3776_v16, 0.0 }
 0x4e8   : > { %2711 = vlog2.f32 %v1619_v18  ;;  %vm1800_vm15 = vcmp.eq.f32.partialorder %v3781_v53, inf  ;;  %vm1802_vm0 = vcmp.eq.f32.partialorder %v3781_v53, 0.0  ;;  %vm1742_vm1 = vcmp.eq.f32.partialorder %v3769_v22, 0.0 }
 0x4e9   : > { %v2702_v46 = vpop.eup %2701  ;;  %v1712_v18 = vmul.f32 0.5, %v1711_v40 }
 0x4ea   : > { %v3773_v32 = vpop.eup %2703  ;;  %v871_v10 = vpop.xlane.xlu0 %870  ;;  %v916_v31 = vmul.f32 %v2702_v46, %v3506_v41 }
 0x4eb   : > { %v2706_v37 = vpop.eup %2705  ;;  %2713 = vrcp.f32 %v871_v10  ;;  %v1746_v12 = vmul.f32 %v3773_v32, %v3739_v61  ;;  %v3802_v10 = vadd.f32 1e-10, %v3634_v62  ;;  %v3815_v62 = vadd.f32 1e-10, %v3724_v63 }
 0x4ec   : > { %v3783_v42 = vpop.eup %2707  ;;  %2252 = vrot.lane.b32.xlu0 %v916_v31, %s2786_s15  ;;  %v874_v29 = vpop.xlane.xlu2 %873  ;;  %2180 = vrot.lane.b32.xlu2 %v3091_v48, %s2785_s14  ;;  %v917_v52 = vmul.f32 %v2706_v37, %v3509_v33  ;;  %2715 = vrsqrt.f32 %v3769_v22  ;;  %v1534_v48 = vmax.f32 %v3711_v51, 0.0  ;;  %v1725_v37 = vsub.f32 1.5, %v1724_v39 }
 0x4ed   : > { %v2710_v41 = vpop.eup %2709  ;;  %2717 = vrcp.f32 %v874_v29  ;;  %v1758_v33 = vmul.f32 %v3783_v42, %v3749_v54  ;;  %v859_v6 = vpop.xlane.xlu1 %858  ;;  %v1747_v29 = vmul.f32 %v3773_v32, %v1746_v12 }
 0x4ee   : > { %v2712_v15 = vpop.eup %2711  ;;  %v1620_v9 = vadd.f32 1.0, %v2710_v41  ;;  %2254 = vrot.lane.b32.xlu1 %v917_v52, %s2786_s15  ;;  %2719 = vrsqrt.f32 %v3776_v16  ;;  %v3807_v41 = vadd.f32 1e-10, %v3702_v26  ;;  %v1713_v26 = vsub.f32 1.5, %v1712_v18 }
 0x4ef   : > { %v1649_v14 = vmul.f32 0.6931472, %v2712_v15  ;;  %2721 = vrsqrt.f32 %v3781_v53  ;;  %v1759_v40 = vmul.f32 %v3783_v42, %v1758_v33  ;;  %v1726_v12 = vmul.f32 %v3746_v1, %v1725_v37 }
 0x4f0   : > { %2723 = vlog2.f32 %v1620_v9  ;;  %v1714_v18 = vmul.f32 %v3754_v59, %v1713_v26 }
 0x4f1   : > { %v2714_v19 = vpop.eup %2713  ;;  %2725 = vrcp.f32 %v850_v36  ;;  %v1670_v3 = vadd.f32 %v1649_v14, %v1534_v48  ;;  %v1748_v48 = vmul.f32 0.5, %v1747_v29 }
 0x4f2   : > { %v3799_v46 = vpop.eup %2715  ;;  %v880_v31 = vpop.xlane.xlu0 %879  ;;  %v919_v35 = vmul.f32 %v2714_v19, %v3522_v20 }
 0x4f3   : > { %v2718_v52 = vpop.eup %2717  ;;  %2727 = vrcp.f32 %v880_v31  ;;  %2046 = vst.msk [vmem:[%s3205_s18 + $0xc0] sm:$0xff] %vm2033_vm3, %v1670_v3  ;;  %v1734_v63 = vmul.f32 %v3799_v46, %v3769_v22 }
 0x4f4   : > { %v3812_v36 = vpop.eup %2719  ;;  %2258 = vrot.lane.b32.xlu0 %v919_v35, %s2786_s15  ;;  %v883_v20 = vpop.xlane.xlu2 %882  ;;  %2186 = vrot.lane.b32.xlu2 %v3214_v7, %s2785_s14  ;;  %v920_v15 = vmul.f32 %v2718_v52, %v3525_v58  ;;  %v1535_v7 = vmax.f32 %v3736_v47, 0.0  ;;  %v1760_v58 = vmul.f32 0.5, %v1759_v40  ;;  %v1727_v40 = vmul.f32 %v1726_v12, %v3714_v11 }
 0x4f5   : > { %v3821_v9 = vpop.eup %2721  ;;  %2729 = vrcp.f32 %v883_v20  ;;  %v1782_v19 = vmul.f32 %v3812_v36, %v3776_v16  ;;  %v868_v37 = vpop.xlane.xlu1 %867  ;;  %v3839_v20 = vadd.f32 1e-10, %v1670_v3 }
 0x4f6   : > { %v2724_v39 = vpop.eup %2723  ;;  %2260 = vrot.lane.b32.xlu1 %v920_v15, %s2786_s15  ;;  %2731 = vrsqrt.f32 %v3802_v10  ;;  %v1794_v35 = vmul.f32 %v3821_v9, %v3781_v53  ;;  %v1749_v15 = vsub.f32 1.5, %v1748_v48  ;;  %v1761_v26 = vsub.f32 1.5, %v1760_v58 }
 0x4f7   : > { %v2726_v14 = vpop.eup %2725  ;;  %v1651_v33 = vmul.f32 0.6931472, %v2724_v39  ;;  %2733 = vrsqrt.f32 %v3807_v41  ;;  %v1735_v39 = vmul.f32 %v3799_v46, %v1734_v63  ;;  %v1783_v3 = vmul.f32 %v3812_v36, %v1782_v19 }
 0x4f8   : > { %2735 = vrsqrt.f32 %v3815_v62  ;;  %v912_v52 = vmul.f32 %v2726_v14, %v3442_v60  ;;  %v1715_v60 = vmul.f32 %v1714_v18, %v3722_v38  ;;  %v1795_v63 = vmul.f32 %v3821_v9, %v1794_v35 }
 0x4f9   : > { %v2728_v1 = vpop.eup %2727  ;;  %v1671_v31 = vadd.f32 %v1651_v33, %v1535_v7  ;;  %2737 = vrcp.f32 %v859_v6  ;;  %v1731_v7 = vand.u32 2147483648, %v3714_v11  ;;  %v1719_v33 = vand.u32 2147483648, %v3722_v38 }
 0x4fa   : > { %v922_v29 = vmul.f32 %v2728_v1, %v3535_v0  ;;  %v1750_v18 = vmul.f32 %v3773_v32, %v1749_v15  ;;  %v1762_v19 = vmul.f32 %v3783_v42, %v1761_v26  ;;  %v1736_v1 = vmul.f32 0.5, %v1735_v39 }
 0x4fb   : > { %v2730_v59 = vpop.eup %2729  ;;  %2047 = vst.msk [vmem:[%s3205_s18 + $0xd0] sm:$0xff] %vm2033_vm3, %v1671_v31  ;;  %v3854_v48 = vadd.f32 1e-10, %v1671_v31  ;;  %2739 = vrsqrt.f32 %v3839_v20  ;;  %v1717_v35 = vsel %vm1716_vm4, %v3722_v38, %v1715_v60  ;;  %v1796_v32 = vmul.f32 0.5, %v1795_v63 }
 0x4fc   : > { %v3844_v6 = vpop.eup %2731  ;;  %2264 = vrot.lane.b32.xlu0 %v922_v29, %s2786_s15  ;;  %2244 = vrot.lane.b32.xlu2 %v912_v52, %s2786_s15  ;;  %v923_v0 = vmul.f32 %v2730_v59, %v3538_v17  ;;  %v1729_v17 = vsel %vm1728_vm5, %v3714_v11, %v1727_v40  ;;  %2741 = vrcp.f32 %v868_v37  ;;  %v1784_v29 = vmul.f32 0.5, %v1783_v3 }
 0x4fd   : > { %v3852_v12 = vpop.eup %2733  ;;  %v1770_v42 = vmul.f32 %v3844_v6, %v3802_v10  ;;  %2743 = vrsqrt.f32 %v3854_v48  ;;  %v3881_v37 = vadd.f32 1e-10, %v3687_v8  ;;  %v1732_v59 = vsel %vm1730_vm7, %v1731_v7, %v1729_v17  ;;  %v877_v8 = vpop.xlane.xlu1 %876 }
 0x4fe   : > { %v3859_v14 = vpop.eup %2735  ;;  %2266 = vrot.lane.b32.xlu1 %v923_v0, %s2786_s15  ;;  %v1818_v52 = vmul.f32 %v3852_v12, %v3807_v41  ;;  %v1751_v39 = vmul.f32 %v1750_v18, %v3739_v61  ;;  %v1763_v0 = vmul.f32 %v1762_v19, %v3749_v54  ;;  %v1737_v60 = vsub.f32 1.5, %v1736_v1 }
 0x4ff   : > { %v2738_v58 = vpop.eup %2737  ;;  %v1830_v26 = vmul.f32 %v3859_v14, %v3815_v62  ;;  %v1785_v11 = vsub.f32 1.5, %v1784_v29  ;;  %v1797_v7 = vsub.f32 1.5, %v1796_v32  ;;  %v1755_v19 = vand.u32 2147483648, %v3739_v61 }
 0x500   : > { %v1513_v31 = vpop.f32.mrf.mxu3  ;;  %v915_v15 = vmul.f32 %v2738_v58, %v3511_v13  ;;  %v1720_v13 = vsel %vm1718_vm6, %v1719_v33, %v1717_v35  ;;  %v1819_v3 = vmul.f32 %v3852_v12, %v1818_v52  ;;  %v1771_v58 = vmul.f32 %v3844_v6, %v1770_v42 }
 0x501   : > { %v3875_v40 = vadd.f32 %v3448_v55, %v1513_v31  ;;  %v3900_v63 = vpop.eup %2739  ;;  %v1831_v38 = vmul.f32 %v3859_v14, %v1830_v26  ;;  %2745 = vrsqrt.f32 %v3881_v37  ;;  %v1753_v31 = vsel %vm1752_vm8, %v3739_v61, %v1751_v39 }
 0x502   : > { %v2742_v18 = vpop.eup %2741  ;;  %v1765_v35 = vsel %vm1764_vm10, %v3749_v54, %v1763_v0  ;;  %v1738_v29 = vmul.f32 %v3799_v46, %v1737_v60  ;;  %2747 = vrcp.f32 %v877_v8  ;;  %v1786_v32 = vmul.f32 %v3812_v36, %v1785_v11 }
 0x503   : > { %v1553_v55 = vand.u32 2147483647, %v3875_v40  ;;  %2030 = vst.msk [vmem:[%s3205_s18 + $0xe0] sm:$0xff] %vm2015_vm2, %v3875_v40  ;;  %v3909_v33 = vpop.eup %2743  ;;  %v1820_v42 = vmul.f32 0.5, %v1819_v3  ;;  %v1798_v46 = vmul.f32 %v3821_v9, %v1797_v7  ;;  %v3929_v39 = vadd.f32 1e-10, %v3752_v34 }
 0x504   : > { %1932 = vrot.lane.b32.xlu0 %v1732_v59, %s2785_s14  ;;  %2250 = vrot.lane.b32.xlu2 %v915_v15, %s2786_s15  ;;  %v1854_v59 = vmul.f32 %v3900_v63, %v3839_v20  ;;  %v3922_v15 = vld [vmem:[%s4341_s10] ss:$0 sm:$0xff]  ;;  %v918_v36 = vmul.f32 %v2742_v18, %v3527_v27  ;;  %v1832_v0 = vmul.f32 0.5, %v1831_v38  ;;  %v1866_v60 = vmul.f32 %v3909_v33, %v3854_v48 }
 0x505   : > { %v1570_v17 = vsub.f32 0.0, %v1553_v55  ;;  %v1772_v55 = vmul.f32 0.5, %v1771_v58  ;;  %v1756_v9 = vsel %vm1754_vm9, %v1755_v19, %v1753_v31  ;;  %v1767_v34 = vand.u32 2147483648, %v3749_v54  ;;  %v3951_v54 = vpop.xlane.xlu1 %885 }
 0x506   : > { %1930 = vrot.lane.b32.xlu1 %v1720_v13, %s2785_s14  ;;  %v1787_v27 = vmul.f32 %v1786_v32, %v3776_v16  ;;  %v1821_v11 = vsub.f32 1.5, %v1820_v42  ;;  %v1739_v3 = vmul.f32 %v1738_v29, %v3769_v22  ;;  %v1799_v58 = vmul.f32 %v1798_v46, %v3781_v53 }
 0x507   : > { %v1601_v1 = vmul.f32 1.442695, %v1570_v17  ;;  %v3943_v13 = vpop.eup %2745  ;;  %v1855_v17 = vmul.f32 %v3900_v63, %v1854_v59  ;;  %v1768_v61 = vsel %vm1766_vm12, %v1767_v34, %v1765_v35  ;;  %v1773_v18 = vsub.f32 1.5, %v1772_v55 }
 0x508   : > { %v1515_v52 = vpop.f32.mrf.mxu3  ;;  %v2748_v19 = vpop.eup %2747  ;;  %v1833_v38 = vsub.f32 1.5, %v1832_v0  ;;  %v1806_v35 = vmul.f32 %v3943_v13, %v3881_v37  ;;  %v1789_v32 = vsel %vm1788_vm13, %v3776_v16, %v1787_v27  ;;  %v1822_v42 = vmul.f32 %v3852_v12, %v1821_v11 }
 0x509   : > { %2749 = vpow2.f32 %v1601_v1  ;;  %v3925_v26 = vadd.f32 %v3922_v15, %v1515_v52  ;;  %v1867_v1 = vmul.f32 %v3909_v33, %v1866_v60  ;;  %v1856_v59 = vmul.f32 0.5, %v1855_v17 }
 0x50a   : > { %2751 = vrsqrt.f32 %v3929_v39  ;;  %v1791_v46 = vand.u32 2147483648, %v3776_v16  ;;  %v1801_v55 = vsel %vm1800_vm15, %v3781_v53, %v1799_v58  ;;  %v921_v0 = vmul.f32 %v2748_v19, %v3540_v49 }
 0x50b   : > { %v1554_v8 = vand.u32 2147483647, %v3925_v26  ;;  %2031 = vst.msk [vmem:[%s3205_s18 + $0xf0] sm:$0xff] %vm2015_vm2, %v3925_v26  ;;  %v1834_v60 = vmul.f32 %v3859_v14, %v1833_v38  ;;  %v1803_v34 = vand.u32 2147483648, %v3781_v53  ;;  %v1741_v12 = vsel %vm1740_vm11, %v3769_v22, %v1739_v3  ;;  %v3981_v17 = vpop.xlane.xlu0 %888 }
 0x50c   : > { %1936 = vrot.lane.b32.xlu0 %v1756_v9, %s2785_s14  ;;  %2256 = vrot.lane.b32.xlu2 %v918_v36, %s2786_s15  ;;  %v1774_v36 = vmul.f32 %v3844_v6, %v1773_v18  ;;  %v1792_v9 = vsel %vm1790_vm14, %v1791_v46, %v1789_v32  ;;  %v1807_v27 = vmul.f32 %v3943_v13, %v1806_v35  ;;  %v1743_v6 = vand.u32 2147483648, %v3769_v22 }
 0x50d   : > { %v1571_v7 = vsub.f32 0.0, %v1554_v8  ;;  %v1868_v8 = vmul.f32 0.5, %v1867_v1  ;;  %v1823_v49 = vmul.f32 %v1822_v42, %v3807_v41  ;;  %v1857_v14 = vsub.f32 1.5, %v1856_v59 }
 0x50e   : > { %1938 = vrot.lane.b32.xlu1 %v1768_v61, %s2785_s14  ;;  %v1804_v11 = vsel %vm1802_vm0, %v1803_v34, %v1801_v55  ;;  %v1835_v61 = vmul.f32 %v1834_v60, %v3815_v62  ;;  %v1775_v58 = vmul.f32 %v1774_v36, %v3802_v10  ;;  %vm1824_vm4 = vcmp.eq.f32.partialorder %v3807_v41, inf }
 0x50f   : > { %v2750_v31 = vpop.eup %2749  ;;  %v1603_v29 = vmul.f32 1.442695, %v1571_v7  ;;  %v1744_v7 = vsel %vm1742_vm1, %v1743_v6, %v1741_v12  ;;  %v1869_v53 = vsub.f32 1.5, %v1868_v8  ;;  %vm1826_vm5 = vcmp.eq.f32.partialorder %v3807_v41, 0.0 }
 0x510   : > { %v1621_v52 = vadd.f32 1.0, %v2750_v31  ;;  %v3973_v16 = vpop.eup %2751  ;;  %v1808_v22 = vmul.f32 0.5, %v1807_v27  ;;  %v1825_v35 = vsel %vm1824_vm4, %v3807_v41, %v1823_v49  ;;  %v1536_v32 = vmax.f32 %v3875_v40, 0.0 }
 0x511   : > { %2753 = vpow2.f32 %v1603_v29  ;;  %v1842_v38 = vmul.f32 %v3973_v16, %v3929_v39  ;;  %v1827_v59 = vand.u32 2147483648, %v3807_v41  ;;  %vm1836_vm6 = vcmp.eq.f32.partialorder %v3815_v62, inf }
 0x512   : > { %2755 = vlog2.f32 %v1621_v52  ;;  %v3983_v3 = vpop.permute.xlu1 %2154  ;;  %v1858_v52 = vmul.f32 %v3900_v63, %v1857_v14  ;;  %v1870_v55 = vmul.f32 %v3909_v33, %v1869_v53  ;;  %vm1838_vm7 = vcmp.eq.f32.partialorder %v3815_v62, 0.0 }
 0x513   : > { %v1828_v63 = vsel %vm1826_vm5, %v1827_v59, %v1825_v35  ;;  %v1843_v60 = vmul.f32 %v3973_v16, %v1842_v38  ;;  %v1809_v34 = vsub.f32 1.5, %v1808_v22  ;;  %vm1778_vm8 = vcmp.eq.f32.partialorder %v3802_v10, 0.0 }
 0x514   : > { %1942 = vrot.lane.b32.xlu0 %v1792_v9, %s2785_s14  ;;  %2262 = vrot.lane.b32.xlu2 %v921_v0, %s2786_s15  ;;  %v1839_v0 = vand.u32 2147483648, %v3815_v62  ;;  %v1859_v9 = vmul.f32 %v1858_v52, %v3839_v20  ;;  %v1871_v49 = vmul.f32 %v1870_v55, %v3854_v48  ;;  %vm1860_vm9 = vcmp.eq.f32.partialorder %v3839_v20, inf }
 0x515   : > { %v1844_v14 = vmul.f32 0.5, %v1843_v60  ;;  %v1779_v53 = vand.u32 2147483648, %v3802_v10  ;;  %v1863_v38 = vand.u32 2147483648, %v3839_v20  ;;  %vm1872_vm10 = vcmp.eq.f32.partialorder %v3854_v48, inf }
 0x516   : > { %1944 = vrot.lane.b32.xlu1 %v1804_v11, %s2785_s14  ;;  %vm1862_vm11 = vcmp.eq.f32.partialorder %v3839_v20, 0.0  ;;  %v1875_v52 = vand.u32 2147483648, %v3854_v48  ;;  %vm1874_vm12 = vcmp.eq.f32.partialorder %v3854_v48, 0.0  ;;  %vm1812_vm13 = vcmp.eq.f32.partialorder %v3881_v37, inf }
 0x517   : > { %v2754_v18 = vpop.eup %2753  ;;  %v1518_v19 = vpop.f32.mrf.mxu3  ;;  %v1815_v60 = vand.u32 2147483648, %v3881_v37  ;;  %vm1814_vm14 = vcmp.eq.f32.partialorder %v3881_v37, 0.0  ;;  %vm1848_vm15 = vcmp.eq.f32.partialorder %v3929_v39, inf  ;;  %vm1850_vm0 = vcmp.eq.f32.partialorder %v3929_v39, 0.0 }
 0x518   : > { %v2756_v1 = vpop.eup %2755  ;;  %v1622_v31 = vadd.f32 1.0, %v2754_v18  ;;  %v3993_v29 = vadd.f32 %v3922_v15, %v1518_v19  ;;  %v1837_v15 = vsel %vm1836_vm6, %v3815_v62, %v1835_v61  ;;  %v1861_v61 = vsel %vm1860_vm9, %v3839_v20, %v1859_v9 }
 0x519   : > { %v1653_v42 = vmul.f32 0.6931472, %v2756_v1  ;;  %v1840_v33 = vsel %vm1838_vm7, %v1839_v0, %v1837_v15  ;;  %v1810_v18 = vmul.f32 %v3943_v13, %v1809_v34  ;;  %v1537_v19 = vmax.f32 %v3925_v26, 0.0 }
 0x51a   : > { %2757 = vlog2.f32 %v1622_v31  ;;  %v1555_v46 = vand.u32 2147483647, %v3993_v29  ;;  %2032 = vst.msk [vmem:[%s3205_s18 + $0x100] sm:$0xff] %vm2015_vm2, %v3993_v29  ;;  %vm1776_vm2 = vcmp.eq.f32.partialorder %v3802_v10, inf  ;;  %v1873_v1 = vsel %vm1872_vm10, %v3854_v48, %v1871_v49 }
 0x51b   : > { %v1672_v36 = vadd.f32 %v1653_v42, %v1536_v32  ;;  %v1777_v6 = vsel %vm1776_vm2, %v3802_v10, %v1775_v58  ;;  %v1864_v35 = vsel %vm1862_vm11, %v1863_v38, %v1861_v61  ;;  %v1845_v13 = vsub.f32 1.5, %v1844_v14 }
 0x51c   : > { %v1572_v8 = vsub.f32 0.0, %v1555_v46  ;;  %1948 = vrot.lane.b32.xlu0 %v1828_v63, %s2785_s14  ;;  %1934 = vrot.lane.b32.xlu2 %v1744_v7, %s2785_s14  ;;  %v4027_v7 = vpop.permute.xlu1 %2160  ;;  %v1780_v58 = vsel %vm1778_vm8, %v1779_v53, %v1777_v6  ;;  %v1811_v32 = vmul.f32 %v1810_v18, %v3881_v37  ;;  %v1876_v59 = vsel %vm1874_vm12, %v1875_v52, %v1873_v1 }
 0x51d   : > { %v4014_v12 = vadd.f32 1e-10, %v1672_v36  ;;  %2048 = vst.msk [vmem:[%s3205_s18 + $0xe0] sm:$0xff] %vm2033_vm3, %v1672_v36  ;;  %v1846_v48 = vmul.f32 %v3973_v16, %v1845_v13  ;;  %vm2119_vm2 = vcmask 785920   ;;  %vm2205_vm8 = vcmask 917248  }
 0x51e   : > { %v1605_v41 = vmul.f32 1.442695, %v1572_v8  ;;  %v4018_v27 = vpop.permute.xlu0 %2158  ;;  %1950 = vrot.lane.b32.xlu1 %v1840_v33, %s2785_s14  ;;  %v1813_v63 = vsel %vm1812_vm13, %v3881_v37, %v1811_v32  ;;  %vm2291_vm9 = vcmask 1048448  }
 0x51f   : > { %v1520_v62 = vpop.f32.mrf.mxu3  ;;  %2759 = vrsqrt.f32 %v4014_v12  ;;  %v1816_v34 = vsel %vm1814_vm14, %v1815_v60, %v1813_v63  ;;  %v1847_v33 = vmul.f32 %v1846_v48, %v3929_v39  ;;  %vm1884_vm1 = vcmp.eq.f32.partialorder %v4014_v12, inf }
 0x520   : > { %v2758_v11 = vpop.eup %2757  ;;  %2761 = vpow2.f32 %v1605_v41  ;;  %vm1886_vm6 = vcmp.eq.f32.partialorder %v4014_v12, 0.0 }
 0x521   : > { %v1655_v22 = vmul.f32 0.6931472, %v2758_v11  ;;  %v1849_v14 = vsel %vm1848_vm15, %v3929_v39, %v1847_v33  ;;  %v1538_v11 = vmax.f32 %v3993_v29, 0.0 }
 0x523   : > { %v1673_v31 = vadd.f32 %v1655_v22, %v1537_v19  ;;  %v1851_v19 = vand.u32 2147483648, %v3929_v39 }
 0x524   : > { %1954 = vrot.lane.b32.xlu0 %v1864_v35, %s2785_s14  ;;  %1940 = vrot.lane.b32.xlu2 %v1780_v58, %s2785_s14  ;;  %v4056_v8 = vpop.permute.xlu1 %2166 }
 0x525   : > { %v2760_v42 = vpop.eup %2759  ;;  %v1707_v20 = vadd.f32 1e-10, %v1673_v31  ;;  %2049 = vst.msk [vmem:[%s3205_s18 + $0xf0] sm:$0xff] %vm2033_vm3, %v1673_v31  ;;  %v1852_v58 = vsel %vm1850_vm0, %v1851_v19, %v1849_v14 }
 0x526   : > { %v2762_v10 = vpop.eup %2761  ;;  %v4046_v46 = vpop.permute.xlu0 %2164  ;;  %1956 = vrot.lane.b32.xlu1 %v1876_v59, %s2785_s14  ;;  %v1878_v15 = vmul.f32 %v2760_v42, %v4014_v12 }
 0x527   : > { %v1623_v55 = vadd.f32 1.0, %v2762_v10  ;;  %v4050_v36 = vpop.xlane.xlu2 %891  ;;  %2763 = vrsqrt.f32 %v1707_v20  ;;  %vm1896_vm4 = vcmp.eq.f32.partialorder %v1707_v20, inf  ;;  %v1899_v59 = vand.u32 2147483648, %v1707_v20 }
 0x528   : > { %v1879_v0 = vmul.f32 %v2760_v42, %v1878_v15  ;;  %v1887_v10 = vand.u32 2147483648, %v4014_v12  ;;  %vm1898_vm5 = vcmp.eq.f32.partialorder %v1707_v20, 0.0 }
 0x529   : > { %2765 = vlog2.f32 %v1623_v55 }
 0x52a   : > { %v1880_v9 = vmul.f32 0.5, %v1879_v0 }
 0x52c   : > { %1946 = vrot.lane.b32.xlu2 %v1816_v34, %s2785_s14  ;;  %v1881_v41 = vsub.f32 1.5, %v1880_v9  ;;  %v4070_v31 = vpop.permute.xlu1 %2172 }
 0x52d   : > { %v2764_v49 = vpop.eup %2763 }
 0x52e   : > { %v1890_v16 = vmul.f32 %v2764_v49, %v1707_v20  ;;  %v4066_v61 = vpop.permute.xlu0 %2170  ;;  %v1882_v18 = vmul.f32 %v2760_v42, %v1881_v41 }
 0x52f   : > { %v2766_v62 = vpop.eup %2765  ;;  %v4062_v6 = vpop.permute.xlu2 %2156 }
 0x530   : > { %v1657_v37 = vmul.f32 0.6931472, %v2766_v62  ;;  %v1891_v53 = vmul.f32 %v2764_v49, %v1890_v16  ;;  %v1883_v52 = vmul.f32 %v1882_v18, %v4014_v12 }
 0x532   : > { %v1674_v22 = vadd.f32 %v1657_v37, %v1538_v11  ;;  %v1892_v38 = vmul.f32 0.5, %v1891_v53  ;;  %v1885_v39 = vsel %vm1884_vm1, %v4014_v12, %v1883_v52 }
 0x533   : > { %v1888_v63 = vsel %vm1886_vm6, %v1887_v10, %v1885_v39 }
 0x534   : > { %v1708_v1 = vadd.f32 1e-10, %v1674_v22  ;;  %1952 = vrot.lane.b32.xlu2 %v1852_v58, %s2785_s14  ;;  %v1893_v35 = vsub.f32 1.5, %v1892_v38  ;;  %2050 = vst.msk [vmem:[%s3205_s18 + $0x100] sm:$0xff] %vm2033_vm3, %v1674_v22  ;;  %v4086_v9 = vpop.permute.xlu1 %2178 }
 0x536   : > { %v1894_v13 = vmul.f32 %v2764_v49, %v1893_v35  ;;  %2767 = vrsqrt.f32 %v1708_v1  ;;  %v4081_v15 = vpop.permute.xlu0 %2176  ;;  %vm1908_vm3 = vcmp.eq.f32.partialorder %v1708_v1, inf  ;;  %v1911_v11 = vand.u32 2147483648, %v1708_v1 }
 0x537   : > { %v4076_v32 = vpop.permute.xlu2 %2162  ;;  %vm1910_vm7 = vcmp.eq.f32.partialorder %v1708_v1, 0.0  ;;  %2769 = vrcp.f32 %v4050_v36 }
 0x538   : > { %v1895_v42 = vmul.f32 %v1894_v13, %v1707_v20  ;;  %2771 = vrcp.f32 %v3951_v54 }
 0x539   : > { %2773 = vrcp.f32 %v3981_v17 }
 0x53a   : > { %v1897_v55 = vsel %vm1896_vm4, %v1707_v20, %v1895_v42 }
 0x53b   : > { %v1900_v48 = vsel %vm1898_vm5, %v1899_v59, %v1897_v55 }
 0x53c   : > { %v2768_v0 = vpop.eup %2767  ;;  %1960 = vrot.lane.b32.xlu0 %v1900_v48, %s2785_s14  ;;  %1958 = vrot.lane.b32.xlu2 %v1888_v63, %s2785_s14  ;;  %v4094_v14 = vpop.permute.xlu1 %2184  ;;  %v1676_v63 = vld [vmem:[%s4131_s23 + $0x8] sm:$0xff] }
 0x53d   : > { %v1902_v60 = vmul.f32 %v2768_v0, %v1708_v1 }
 0x53e   : > { %v4090_v16 = vpop.permute.xlu0 %2182 }
 0x53f   : > { %v4088_v34 = vpop.permute.xlu2 %2168  ;;  %v1903_v33 = vmul.f32 %v2768_v0, %v1902_v60  ;;  %4343 = vst [vmem:[#allocation2_spill] sm:$0xff] %v4090_v16  ;;  %v1675_v60 = vld [vmem:[%s4131_s23] sm:$0xff] }
 0x540   : > { %v1679_v16 = vld [vmem:[%s4131_s23 + $0x20] sm:$0xff] }
 0x541   : > { %v1904_v41 = vmul.f32 0.5, %v1903_v33 }
 0x543   : > { %v1905_v49 = vsub.f32 1.5, %v1904_v41 }
 0x545   : > { %v1906_v20 = vmul.f32 %v2768_v0, %v1905_v49 }
 0x546   : > { %v4097_v18 = vpop.permute.xlu0 %2240 }
 0x547   : > { %v4092_v62 = vpop.permute.xlu2 %2174  ;;  %v1907_v12 = vmul.f32 %v1906_v20, %v1708_v1 }
 0x549   : > { %v1909_v37 = vsel %vm1908_vm3, %v1708_v1, %v1907_v12 }
 0x54a   : > { %v1912_v53 = vsel %vm1910_vm7, %v1911_v11, %v1909_v37  ;;  %v1678_v37 = vld [vmem:[%s4131_s23 + $0x18] sm:$0xff] }
 0x54b   : > { %1962 = vrot.lane.b32.xlu1 %v1912_v53, %s2785_s14  ;;  %v1677_v53 = vld [vmem:[%s4131_s23 + $0x10] sm:$0xff] }
 0x54f   : > { %v4099_v19 = vpop.permute.xlu2 %2180 }
 0x550   : > { %4344 = vst [vmem:[#allocation3_spill] sm:$0xff] %v4099_v19  ;;  %v4101_v22 = vpop.permute.xlu1 %2242 }
 0x556   : > { %v4103_v38 = vpop.permute.xlu0 %2246 }
 0x557   : > { %v4105_v58 = vpop.permute.xlu2 %2186 }
 0x558   : > { %4345 = vst [vmem:[#allocation4_spill] sm:$0xff] %v4105_v58  ;;  %v4107_v35 = vpop.permute.xlu1 %2248 }
 0x55e   : > { %v4109_v52 = vpop.permute.xlu0 %2252 }
 0x55f   : > { %v4111_v13 = vpop.permute.xlu2 %2244 }
 0x560   : > { %v4113_v1 = vpop.permute.xlu1 %2254 }
 0x566   : > { %v4115_v42 = vpop.permute.xlu0 %2258 }
 0x567   : > { %v4117_v39 = vpop.permute.xlu2 %2250 }
 0x568   : > { %v4119_v59 = vpop.permute.xlu1 %2260 }
 0x56e   : > { %v4121_v10 = vpop.permute.xlu0 %2264 }
 0x56f   : > { %v4123_v55 = vpop.permute.xlu2 %2256 }
 0x570   : > { %v4125_v48 = vpop.permute.xlu1 %2266 }
 0x571   : > { %4346 = vst [vmem:[#allocation5_spill] sm:$0xff] %v4125_v48 }
 0x576   : > { %v1933_v0 = vpop.permute.xlu0 %1932 }
 0x577   : > { %v1982_v33 = vmul.f32 %v1933_v0, %v1676_v63  ;;  %v4135_v41 = vpop.permute.xlu2 %2262 }
 0x578   : > { %4347 = vst [vmem:[#allocation6_spill] sm:$0xff] %v4135_v41  ;;  %v1931_v49 = vpop.permute.xlu1 %1930 }
 0x579   : > { %v1999_v20 = vadd.f32 %v1982_v33, %v3461_v25  ;;  %v1981_v12 = vmul.f32 %v1931_v49, %v1675_v60  ;;  %v1681_v33 = vld [vmem:[%s4131_s23 + $0x30] sm:$0xff] }
 0x57b   : > { %v1998_v11 = vadd.f32 %v1981_v12, %v3454_v30  ;;  %2070 = vrot.lane.b32.xlu0 %v1999_v20, %s2784_s21  ;;  %v1682_v20 = vld [vmem:[%s4131_s23 + $0x38] sm:$0xff] }
 0x57d   : > { %2068 = vrot.lane.b32.xlu2 %v1998_v11, %s2784_s21  ;;  %v1684_v11 = vld [vmem:[%s4131_s23 + $0x48] sm:$0xff] }
 0x57e   : > { %v1937_v58 = vpop.permute.xlu0 %1936 }
 0x57f   : > { %v1984_v63 = vmul.f32 %v1937_v58, %v1678_v37  ;;  %v1935_v0 = vpop.permute.xlu2 %1934  ;;  %v1680_v58 = vld [vmem:[%s4131_s23 + $0x28] sm:$0xff]  ;;  %v1683_v37 = vld [vmem:[%s4131_s23 + $0x40] sm:$0xff] }
 0x580   : > { %v1983_v48 = vmul.f32 %v1935_v0, %v1677_v53  ;;  %v1939_v19 = vpop.permute.xlu1 %1938 }
 0x581   : > { %v1985_v41 = vmul.f32 %v1939_v19, %v1679_v16  ;;  %v2001_v30 = vadd.f32 %v1984_v63, %v3561_v57  ;;  %v1685_v63 = vld [vmem:[%s4131_s23 + $0x50] sm:$0xff] }
 0x582   : > { %v2000_v25 = vadd.f32 %v1983_v48, %v3550_v56 }
 0x583   : > { %v2002_v60 = vadd.f32 %v1985_v41, %v3569_v44 }
 0x584   : > { %2072 = vrot.lane.b32.xlu1 %v2000_v25, %s2784_s21 }
 0x585   : > { %2074 = vrot.lane.b32.xlu2 %v2001_v30, %s2784_s21  ;;  %2076 = vrot.lane.b32.xlu0 %v2002_v60, %s2784_s21 }
 0x586   : > { %v1943_v49 = vpop.permute.xlu0 %1942 }
 0x587   : > { %v1987_v16 = vmul.f32 %v1943_v49, %v1681_v33  ;;  %v1941_v19 = vpop.permute.xlu2 %1940  ;;  %v1686_v49 = vld [vmem:[%s4131_s23 + $0x58] sm:$0xff] }
 0x588   : > { %v1986_v56 = vmul.f32 %v1941_v19, %v1680_v58  ;;  %v1945_v48 = vpop.permute.xlu1 %1944  ;;  %v1687_v58 = vld [vmem:[%s4131_s23 + $0x60] sm:$0xff] }
 0x589   : > { %v1988_v57 = vmul.f32 %v1945_v48, %v1682_v20  ;;  %v2004_v41 = vadd.f32 %v1987_v16, %v3597_v21  ;;  %v1688_v16 = vld [vmem:[%s4131_s23 + $0x68] sm:$0xff] }
 0x58a   : > { %v2003_v44 = vadd.f32 %v1986_v56, %v3582_v43 }
 0x58b   : > { %v2005_v12 = vadd.f32 %v1988_v57, %v3613_v5 }
 0x58c   : > { %2078 = vrot.lane.b32.xlu1 %v2003_v44, %s2784_s21 }
 0x58d   : > { %2080 = vrot.lane.b32.xlu2 %v2004_v41, %s2784_s21  ;;  %2082 = vrot.lane.b32.xlu0 %v2005_v12, %s2784_s21  ;;  %v1689_v41 = vld [vmem:[%s4131_s23 + $0x70] sm:$0xff] }
 0x58e   : > { %v1949_v53 = vpop.permute.xlu0 %1948 }
 0x58f   : > { %v1990_v0 = vmul.f32 %v1949_v53, %v1684_v11  ;;  %v1947_v25 = vpop.permute.xlu2 %1946 }
 0x590   : > { %v1989_v43 = vmul.f32 %v1947_v25, %v1683_v37  ;;  %v1951_v30 = vpop.permute.xlu1 %1950 }
 0x591   : > { %v1991_v21 = vmul.f32 %v1951_v30, %v1685_v63  ;;  %v2007_v60 = vadd.f32 %v1990_v0, %v3651_v2 }
 0x592   : > { %v2006_v5 = vadd.f32 %v1989_v43, %v3630_v45 }
 0x593   : > { %v2008_v33 = vadd.f32 %v1991_v21, %v3668_v23 }
 0x594   : > { %2084 = vrot.lane.b32.xlu1 %v2006_v5, %s2784_s21 }
 0x595   : > { %2086 = vrot.lane.b32.xlu2 %v2007_v60, %s2784_s21  ;;  %2088 = vrot.lane.b32.xlu0 %v2008_v33, %s2784_s21 }
 0x596   : > { %v1955_v20 = vpop.permute.xlu0 %1954 }
 0x597   : > { %v1993_v19 = vmul.f32 %v1955_v20, %v1687_v58  ;;  %v1953_v56 = vpop.permute.xlu2 %1952 }
 0x598   : > { %v1992_v48 = vmul.f32 %v1953_v56, %v1686_v49  ;;  %v1957_v57 = vpop.permute.xlu1 %1956 }
 0x599   : > { %v1994_v45 = vmul.f32 %v1957_v57, %v1688_v16  ;;  %v2010_v23 = vadd.f32 %v1993_v19, %v3711_v51 }
 0x59a   : > { %v2009_v2 = vadd.f32 %v1992_v48, %v3685_v50  ;;  %v2770_v50 = vpop.eup %2769 }
 0x59b   : > { %v2011_v44 = vadd.f32 %v1994_v45, %v3736_v47  ;;  %v926_v51 = vmul.f32 %v2770_v50, %v3632_v24  ;;  %v1690_v47 = vld [vmem:[%s4131_s23 + $0x78] sm:$0xff]  ;;  %v2772_v25 = vpop.eup %2771  ;;  %v1691_v24 = vld [vmem:[%s4131_s23 + $0x80] sm:$0xff] }
 0x59c   : > { %2090 = vrot.lane.b32.xlu1 %v2009_v2, %s2784_s21  ;;  %v2774_v54 = vpop.eup %2773 }
 0x59d   : > { %2092 = vrot.lane.b32.xlu2 %v2010_v23, %s2784_s21  ;;  %2094 = vrot.lane.b32.xlu0 %v2011_v44, %s2784_s21 }
 0x59f   : > { %v1959_v12 = vpop.permute.xlu2 %1958 }
 0x5a0   : > { %v1995_v11 = vmul.f32 %v1959_v12, %v1689_v41 }
 0x5a2   : > { %v2012_v37 = vadd.f32 %v1995_v11, %v3875_v40  ;;  %v924_v40 = vmul.f32 %v2772_v25, %v3556_v28  ;;  %v925_v28 = vmul.f32 %v2774_v54, %v3576_v4 }
 0x5a4   : > { %2096 = vrot.lane.b32.xlu1 %v2012_v37, %s2784_s21 }
 0x5ac   : > { %2272 = vrot.lane.b32.xlu1 %v926_v51, %s2786_s15 }
 0x5ae   : > { %v1961_v53 = vpop.permute.xlu0 %1960 }
 0x5af   : > { %v1996_v63 = vmul.f32 %v1961_v53, %v1690_v47 }
 0x5b1   : > { %v2013_v0 = vadd.f32 %v1996_v63, %v3925_v26 }
 0x5b3   : > { %2098 = vrot.lane.b32.xlu2 %v2013_v0, %s2784_s21 }
 0x5bb   : > { %2268 = vrot.lane.b32.xlu2 %v924_v40, %s2786_s15 }
 0x5bd   : > { %v1963_v36 = vpop.permute.xlu1 %1962 }
 0x5be   : > { %v1997_v43 = vmul.f32 %v1963_v36, %v1691_v24 }
 0x5c0   : > { %v2014_v26 = vadd.f32 %v1997_v43, %v3993_v29 }
 0x5c2   : > { %2100 = vrot.lane.b32.xlu0 %v2014_v26, %s2784_s21 }
 0x5ca   : > { %2270 = vrot.lane.b32.xlu0 %v925_v28, %s2786_s15 }
 0x5d7   : > { %v2069_v30 = vpop.permute.xlu2 %2068 }
 0x5d8   : > { %2120 = vst.msk [vmem:[%s3205_s18] sm:$0xff] %vm2119_vm2, %v2069_v30 }
 0x5d9   : > { %2206 = vst.msk [vmem:[%s3205_s18] sm:$0xff] %vm2205_vm8, %v3983_v3 }
 0x5da   : > { %2292 = vst.msk [vmem:[%s3205_s18] sm:$0xff] %vm2291_vm9, %v4097_v18  ;;  %v4349_v18 = vld [vmem:[#allocation3_spill] sm:$0xff] }
 0x5df   : > { %v2075_v4 = vpop.permute.xlu2 %2074 }
 0x5e0   : > { %2123 = vst.msk [vmem:[%s3205_s18 + $0x30] sm:$0xff] %vm2119_vm2, %v2075_v4 }
 0x5e1   : > { %2209 = vst.msk [vmem:[%s3205_s18 + $0x30] sm:$0xff] %vm2205_vm8, %v4027_v7 }
 0x5e2   : > { %2295 = vst.msk [vmem:[%s3205_s18 + $0x30] sm:$0xff] %vm2291_vm9, %v4103_v38 }
 0x5e7   : > { %v2081_v17 = vpop.permute.xlu2 %2080 }
 0x5e8   : > { %2126 = vst.msk [vmem:[%s3205_s18 + $0x60] sm:$0xff] %vm2119_vm2, %v2081_v17 }
 0x5e9   : > { %2212 = vst.msk [vmem:[%s3205_s18 + $0x60] sm:$0xff] %vm2205_vm8, %v4056_v8 }
 0x5ea   : > { %2298 = vst.msk [vmem:[%s3205_s18 + $0x60] sm:$0xff] %vm2291_vm9, %v4109_v52 }
 0x5ed   : > { %v2071_v3 = vpop.permute.xlu0 %2070 }
 0x5ee   : > { %2121 = vst.msk [vmem:[%s3205_s18 + $0x10] sm:$0xff] %vm2119_vm2, %v2071_v3 }
 0x5ef   : > { %2207 = vst.msk [vmem:[%s3205_s18 + $0x10] sm:$0xff] %vm2205_vm8, %v4062_v6  ;;  %v2087_v29 = vpop.permute.xlu2 %2086 }
 0x5f0   : > { %2293 = vst.msk [vmem:[%s3205_s18 + $0x10] sm:$0xff] %vm2291_vm9, %v4101_v22  ;;  %v4350_v22 = vld [vmem:[#allocation5_spill] sm:$0xff] }
 0x5f1   : > { %2129 = vst.msk [vmem:[%s3205_s18 + $0x90] sm:$0xff] %vm2119_vm2, %v2087_v29 }
 0x5f2   : > { %2215 = vst.msk [vmem:[%s3205_s18 + $0x90] sm:$0xff] %vm2205_vm8, %v4070_v31 }
 0x5f3   : > { %2301 = vst.msk [vmem:[%s3205_s18 + $0x90] sm:$0xff] %vm2291_vm9, %v4115_v42 }
 0x5f6   : > { %v2073_v7 = vpop.permute.xlu1 %2072 }
 0x5f7   : > { %2122 = vst.msk [vmem:[%s3205_s18 + $0x20] sm:$0xff] %vm2119_vm2, %v2073_v7  ;;  %v2093_v8 = vpop.permute.xlu2 %2092  ;;  %v2077_v6 = vpop.permute.xlu0 %2076 }
 0x5f8   : > { %2208 = vst.msk [vmem:[%s3205_s18 + $0x20] sm:$0xff] %vm2205_vm8, %v4018_v27 }
 0x5f9   : > { %2294 = vst.msk [vmem:[%s3205_s18 + $0x20] sm:$0xff] %vm2291_vm9, %v4111_v13  ;;  %v4352_v13 = vld [vmem:[#allocation4_spill] sm:$0xff] }
 0x5fa   : > { %2132 = vst.msk [vmem:[%s3205_s18 + $0xc0] sm:$0xff] %vm2119_vm2, %v2093_v8 }
 0x5fb   : > { %2218 = vst.msk [vmem:[%s3205_s18 + $0xc0] sm:$0xff] %vm2205_vm8, %v4086_v9 }
 0x5fc   : > { %2304 = vst.msk [vmem:[%s3205_s18 + $0xc0] sm:$0xff] %vm2291_vm9, %v4121_v10 }
 0x5fd   : > { %2124 = vst.msk [vmem:[%s3205_s18 + $0x40] sm:$0xff] %vm2119_vm2, %v2077_v6 }
 0x5fe   : > { %2210 = vst.msk [vmem:[%s3205_s18 + $0x40] sm:$0xff] %vm2205_vm8, %v4076_v32  ;;  %v2079_v27 = vpop.permute.xlu1 %2078 }
 0x5ff   : > { %2296 = vst.msk [vmem:[%s3205_s18 + $0x40] sm:$0xff] %vm2291_vm9, %v4107_v35  ;;  %v2083_v31 = vpop.permute.xlu0 %2082  ;;  %v4351_v35 = vld [vmem:[#allocation2_spill] sm:$0xff] }
 0x600   : > { %2125 = vst.msk [vmem:[%s3205_s18 + $0x50] sm:$0xff] %vm2119_vm2, %v2079_v27 }
 0x601   : > { %2211 = vst.msk [vmem:[%s3205_s18 + $0x50] sm:$0xff] %vm2205_vm8, %v4046_v46 }
 0x602   : > { %2297 = vst.msk [vmem:[%s3205_s18 + $0x50] sm:$0xff] %vm2291_vm9, %v4117_v39 }
 0x603   : > { %2127 = vst.msk [vmem:[%s3205_s18 + $0x70] sm:$0xff] %vm2119_vm2, %v2083_v31 }
 0x604   : > { %2213 = vst.msk [vmem:[%s3205_s18 + $0x70] sm:$0xff] %vm2205_vm8, %v4088_v34 }
 0x605   : > { %2299 = vst.msk [vmem:[%s3205_s18 + $0x70] sm:$0xff] %vm2291_vm9, %v4113_v1 }
 0x606   : > { %v2085_v32 = vpop.permute.xlu1 %2084 }
 0x607   : > { %2128 = vst.msk [vmem:[%s3205_s18 + $0x80] sm:$0xff] %vm2119_vm2, %v2085_v32  ;;  %v2089_v46 = vpop.permute.xlu0 %2088 }
 0x608   : > { %2214 = vst.msk [vmem:[%s3205_s18 + $0x80] sm:$0xff] %vm2205_vm8, %v4066_v61 }
 0x609   : > { %2300 = vst.msk [vmem:[%s3205_s18 + $0x80] sm:$0xff] %vm2291_vm9, %v4123_v55 }
 0x60a   : > { %2130 = vst.msk [vmem:[%s3205_s18 + $0xa0] sm:$0xff] %vm2119_vm2, %v2089_v46 }
 0x60b   : > { %2216 = vst.msk [vmem:[%s3205_s18 + $0xa0] sm:$0xff] %vm2205_vm8, %v4092_v62  ;;  %v4348_v62 = vld [vmem:[#allocation6_spill] sm:$0xff] }
 0x60c   : > { %2302 = vst.msk [vmem:[%s3205_s18 + $0xa0] sm:$0xff] %vm2291_vm9, %v4119_v59 }
 0x60d   : > { %v2099_v9 = vpop.permute.xlu2 %2098 }
 0x60e   : > { %2135 = vst.msk [vmem:[%s3205_s18 + $0xf0] sm:$0xff] %vm2119_vm2, %v2099_v9  ;;  %v2091_v34 = vpop.permute.xlu1 %2090 }
 0x60f   : > { %2221 = vst.msk [vmem:[%s3205_s18 + $0xf0] sm:$0xff] %vm2205_vm8, %v4094_v14  ;;  %v2095_v61 = vpop.permute.xlu0 %2094 }
 0x610   : > { %2131 = vst.msk [vmem:[%s3205_s18 + $0xb0] sm:$0xff] %vm2119_vm2, %v2091_v34 }
 0x611   : > { %2217 = vst.msk [vmem:[%s3205_s18 + $0xb0] sm:$0xff] %vm2205_vm8, %v4081_v15 }
 0x612   : > { %2303 = vst.msk [vmem:[%s3205_s18 + $0xb0] sm:$0xff] %vm2291_vm9, %v4348_v62 }
 0x613   : > { %2133 = vst.msk [vmem:[%s3205_s18 + $0xd0] sm:$0xff] %vm2119_vm2, %v2095_v61 }
 0x614   : > { %2219 = vst.msk [vmem:[%s3205_s18 + $0xd0] sm:$0xff] %vm2205_vm8, %v4349_v18 }
 0x615   : > { %2305 = vst.msk [vmem:[%s3205_s18 + $0xd0] sm:$0xff] %vm2291_vm9, %v4350_v22  ;;  %v2269_v38 = vpop.permute.xlu2 %2268 }
 0x616   : > { %v2097_v14 = vpop.permute.xlu1 %2096 }
 0x617   : > { %2134 = vst.msk [vmem:[%s3205_s18 + $0xe0] sm:$0xff] %vm2119_vm2, %v2097_v14 }
 0x618   : > { %2220 = vst.msk [vmem:[%s3205_s18 + $0xe0] sm:$0xff] %vm2205_vm8, %v4351_v35 }
 0x619   : > { %2306 = vst.msk [vmem:[%s3205_s18 + $0xe0] sm:$0xff] %vm2291_vm9, %v2269_v38 }
 0x61e   : > { %v2273_v52 = vpop.permute.xlu1 %2272 }
 0x634   : > { %v2101_v15 = vpop.permute.xlu0 %2100 }
 0x635   : > { %2136 = vst.msk [vmem:[%s3205_s18 + $0x100] sm:$0xff] %vm2119_vm2, %v2101_v15 }
 0x636   : > { %2222 = vst.msk [vmem:[%s3205_s18 + $0x100] sm:$0xff] %vm2205_vm8, %v4352_v13 }
 0x637   : > { %2308 = vst.msk [vmem:[%s3205_s18 + $0x100] sm:$0xff] %vm2291_vm9, %v2273_v52 }
 0x63c   : > { %v2271_v1 = vpop.permute.xlu0 %2270 }
 0x63d   : > { %2307 = vst.msk [vmem:[%s3205_s18 + $0xf0] sm:$0xff] %vm2291_vm9, %v2271_v1 }
 0x63e PF: > { %s21_s17 = sadd.s32 1, %s2782_s17  }
 0x63f   : > { %p18_p4 = scmp.ge.s32.totalorder %s21_s17, 4  }
 0x641   :  { %20 = sbr.rel (!%p18_p4) target bundleno = 1 (0x1), region = 100 }

</bundles_post_ra>
